<compile_context>
chip_gen: v7x
topology: tpu7x:2x2x1
jax: 0.10.0
libtpu: 0.0.40
codegen_flags: <defaults>
</compile_context>

<pallas_src>
import jax
import jax.numpy as jnp
from jax.experimental import pallas as pl
from jax.experimental.pallas import tpu as pltpu

# ---------------- configuration (small, consistent with the module) ----------
B = 2          # batch
IN_CH = 4      # in_channels
OUT_CH = 4     # out_channels
HIDDEN = 32    # hidden_channels
KSIZE = 5      # kernel_size (odd, as WN asserts)
DIL_RATE = 2   # dilation_rate
N_LAYERS = 4   # n_layers
T = 16         # time steps (row tile; multiple of 8)
EPS = 1e-5     # LayerNorm eps

BT = B * T
KH = KSIZE * HIDDEN
MAXPAD = (DIL_RATE ** (N_LAYERS - 1)) * (KSIZE - 1) // 2   # largest dilation pad
HP_ROWS = T + 2 * MAXPAD                                    # padded scratch rows


# ---------------------------- Pallas kernel ----------------------------------
def wn_encoder_kernel(lens_ref,                      # SMEM (B,) int32 (prefetch)
                      x_ref,                         # (T, IN_CH) row tile
                      pre_w_ref, pre_b_ref,          # (IN_CH, H), (1, H)
                      in_w_t_ref, in_w_s_ref,        # (L, K, H, H) each
                      in_b_t_ref, in_b_s_ref,        # (L, H) each
                      rs_res_w_ref, rs_res_b_ref,    # (L-1, H, H), (L-1, H)
                      rs_skip_w_ref, rs_skip_b_ref,  # (L, H, H),   (L, H)
                      proj_w_ref, proj_b_ref,        # (H, OUT_CH), (1, OUT_CH)
                      gamma_ref, beta_ref,           # (1, OUT_CH) each
                      out_ref,                       # (T, OUT_CH) row tile
                      hp_ref):                       # VMEM (T+2*MAXPAD, H) scratch
    b = pl.program_id(0)
    length = lens_ref[b]

    # Per-tile sequence mask; broadcasts hoisted once.
    t = jax.lax.broadcasted_iota(jnp.int32, (T, 1), 0)
    mask = (t < length).astype(jnp.float32)          # (T, 1)
    mask_h = jnp.broadcast_to(mask, (T, HIDDEN))
    mask_o = jnp.broadcast_to(mask, (T, OUT_CH))

    # pre: 1x1 conv + mask  -> (T, H)
    h = (jnp.dot(x_ref[...], pre_w_ref[...], preferred_element_type=jnp.float32)
         + pre_b_ref[...]) * mask_h

    # Zero-padded hidden-state slab in VMEM scratch.  Padding rows are zeroed
    # once per tile; the valid region is refreshed after every residual update,
    # so taps read zeros outside the sequence with no per-tap mask work.
    zpad = jnp.zeros((MAXPAD, HIDDEN), jnp.float32)
    hp_ref[pl.ds(0, MAXPAD), :] = zpad
    hp_ref[pl.ds(MAXPAD + T, MAXPAD), :] = zpad
    hp_ref[pl.ds(MAXPAD, T), :] = h

    skip = jnp.zeros((T, HIDDEN), jnp.float32)
    for i in range(N_LAYERS):                        # static unroll
        d = DIL_RATE ** i
        pad = d * (KSIZE - 1) // 2

        # Dilated conv = sum over taps of small (T,H)x(H,H) dots, accumulated
        # in f32.  Tap k reads h[t + k*d - pad] via a static sublane-offset
        # load from the padded slab (no roll, no concat relayout).
        z_t = jnp.zeros((T, HIDDEN), jnp.float32)
        z_s = jnp.zeros((T, HIDDEN), jnp.float32)
        for k in range(KSIZE):
            off = k * d - pad                        # static offset
            if off <= -T or off >= T:
                continue                             # window is pure zero padding
            tap = hp_ref[pl.ds(MAXPAD + off, T), :]
            z_t = z_t + jnp.dot(tap, in_w_t_ref[i, k],
                                preferred_element_type=jnp.float32)
            z_s = z_s + jnp.dot(tap, in_w_s_ref[i, k],
                                preferred_element_type=jnp.float32)

        acts = (jnp.tanh(z_t + in_b_t_ref[pl.ds(i, 1), :])
                * jax.nn.sigmoid(z_s + in_b_s_ref[pl.ds(i, 1), :]))   # (T, H)

        # res / skip 1x1 convs (last layer has only a skip half, like PyTorch WN)
        skip = skip + (jnp.dot(acts, rs_skip_w_ref[i],
                               preferred_element_type=jnp.float32)
                       + rs_skip_b_ref[pl.ds(i, 1), :])
        if i < N_LAYERS - 1:
            res = (jnp.dot(acts, rs_res_w_ref[i],
                           preferred_element_type=jnp.float32)
                   + rs_res_b_ref[pl.ds(i, 1), :])
            h = (h + res) * mask_h
            hp_ref[pl.ds(MAXPAD, T), :] = h          # refresh valid region

    wn_out = skip * mask_h                           # (T, H)

    # proj: 1x1 conv + mask  -> (T, OUT_CH)
    y = (jnp.dot(wn_out, proj_w_ref[...], preferred_element_type=jnp.float32)
         + proj_b_ref[...]) * mask_o

    # LayerNorm over the channel axis (applied to masked rows too, like PyTorch).
    mean = jnp.mean(y, axis=-1, keepdims=True)
    var = jnp.mean((y - mean) ** 2, axis=-1, keepdims=True)
    y = (y - mean) * jax.lax.rsqrt(var + EPS)
    out_ref[...] = (y * gamma_ref[...] + beta_ref[...]).astype(out_ref.dtype)


# ------------------------------ wrapper ---------------------------------------
def _resident(shape):
    # Constant index_map: block == full array, loaded once, VMEM-resident.
    return pl.BlockSpec(shape, lambda b, lens, _n=len(shape): (0,) * _n)


def wn_encoder(x_nct, x_lengths, params):
    """x_nct: (B, IN_CH, T) PyTorch NCT layout. Returns (B, OUT_CH, T)."""
    x_flat = (jnp.transpose(x_nct, (0, 2, 1))
              .reshape(BT, IN_CH).astype(jnp.float32))

    grid_spec = pltpu.PrefetchScalarGridSpec(
        num_scalar_prefetch=1,
        grid=(B,),                                   # row tiles: one sequence/step
        in_specs=[
            pl.BlockSpec((T, IN_CH), lambda b, lens: (b, 0)),      # x row tile
            _resident((IN_CH, HIDDEN)), _resident((1, HIDDEN)),    # pre
            _resident((N_LAYERS, KSIZE, HIDDEN, HIDDEN)),          # in_w tanh half
            _resident((N_LAYERS, KSIZE, HIDDEN, HIDDEN)),          # in_w sigmoid half
            _resident((N_LAYERS, HIDDEN)),                         # in_b tanh half
            _resident((N_LAYERS, HIDDEN)),                         # in_b sigmoid half
            _resident((N_LAYERS - 1, HIDDEN, HIDDEN)),             # res weights
            _resident((N_LAYERS - 1, HIDDEN)),                     # res biases
            _resident((N_LAYERS, HIDDEN, HIDDEN)),                 # skip weights
            _resident((N_LAYERS, HIDDEN)),                         # skip biases
            _resident((HIDDEN, OUT_CH)), _resident((1, OUT_CH)),   # proj
            _resident((1, OUT_CH)), _resident((1, OUT_CH)),        # gamma, beta
        ],
        out_specs=pl.BlockSpec((T, OUT_CH), lambda b, lens: (b, 0)),
        scratch_shapes=[pltpu.VMEM((HP_ROWS, HIDDEN), jnp.float32)],
    )
    out_flat = pl.pallas_call(
        wn_encoder_kernel,
        out_shape=jax.ShapeDtypeStruct((BT, OUT_CH), jnp.float32),
        grid_spec=grid_spec,
        # Row-tile axis is independent -> parallel (2 TCs on v7x split it; no-op
        # on v5e/v6e).
        compiler_params=pltpu.CompilerParams(dimension_semantics=("parallel",)),
    )(x_lengths.astype(jnp.int32), x_flat,
      params["pre_w"], params["pre_b"],
      params["in_w_t"], params["in_w_s"], params["in_b_t"], params["in_b_s"],
      params["rs_res_w"], params["rs_res_b"],
      params["rs_skip_w"], params["rs_skip_b"],
      params["proj_w"], params["proj_b"], params["gamma"], params["beta"])
    return jnp.transpose(out_flat.reshape(B, T, OUT_CH), (0, 2, 1))  # (B, C, T)


# --------------------- pure-JAX reference (for verification) ------------------
def wn_encoder_ref(x_nct, x_lengths, params):
    x = jnp.transpose(x_nct, (0, 2, 1)).astype(jnp.float32)           # (B, T, C)
    mask = (jnp.arange(T)[None, :, None] < x_lengths[:, None, None]).astype(jnp.float32)
    h = (jnp.einsum("btc,ch->bth", x, params["pre_w"]) + params["pre_b"]) * mask
    skip = jnp.zeros((B, T, HIDDEN), jnp.float32)
    for i in range(N_LAYERS):
        d = DIL_RATE ** i
        pad = d * (KSIZE - 1) // 2
        hp = jnp.pad(h, ((0, 0), (pad, pad), (0, 0)))
        slab = jnp.concatenate([hp[:, k * d:k * d + T, :] for k in range(KSIZE)],
                               axis=-1)                               # (B, T, K*H)
        w_t = params["in_w_t"][i].reshape(KH, HIDDEN)                 # k-major
        w_s = params["in_w_s"][i].reshape(KH, HIDDEN)
        z_t = jnp.einsum("btk,ko->bto", slab, w_t) + params["in_b_t"][i]
        z_s = jnp.einsum("btk,ko->bto", slab, w_s) + params["in_b_s"][i]
        acts = jnp.tanh(z_t) * jax.nn.sigmoid(z_s)
        skip = skip + (jnp.einsum("bth,ho->bto", acts, params["rs_skip_w"][i])
                       + params["rs_skip_b"][i])
        if i < N_LAYERS - 1:
            res = (jnp.einsum("bth,ho->bto", acts, params["rs_res_w"][i])
                   + params["rs_res_b"][i])
            h = (h + res) * mask
    wn_out = skip * mask
    y = (jnp.einsum("bth,ho->bto", wn_out, params["proj_w"]) + params["proj_b"]) * mask
    mean = jnp.mean(y, axis=-1, keepdims=True)
    var = jnp.mean((y - mean) ** 2, axis=-1, keepdims=True)
    y = (y - mean) * jax.lax.rsqrt(var + EPS)
    y = y * params["gamma"] + params["beta"]
    return jnp.transpose(y, (0, 2, 1))


# ------------------------------ params ----------------------------------------
def make_params(key):
    ks = jax.random.split(key, 12)

    def init(k, shape, scale=0.1):
        return scale * jax.random.normal(k, shape, jnp.float32)

    # Mapping to PyTorch WN weights (for checkpoint loading):
    #   in_w_t[i, k, cin, cout] = in_layers[i].weight[cout,     cin, k]
    #   in_w_s[i, k, cin, cout] = in_layers[i].weight[H + cout, cin, k]
    #   rs_res_w[i, cin, cout]  = res_skip_layers[i].weight[cout, cin, 0]            (i < L-1)
    #   rs_skip_w[i, cin, cout] = res_skip_layers[i].weight[cout + (H if i<L-1 else 0), cin, 0]
    return dict(
        pre_w=init(ks[0], (IN_CH, HIDDEN)),
        pre_b=init(ks[1], (1, HIDDEN)),
        in_w_t=init(ks[2], (N_LAYERS, KSIZE, HIDDEN, HIDDEN)),
        in_w_s=init(ks[3], (N_LAYERS, KSIZE, HIDDEN, HIDDEN)),
        in_b_t=init(ks[4], (N_LAYERS, HIDDEN)),
        in_b_s=init(ks[5], (N_LAYERS, HIDDEN)),
        rs_res_w=init(ks[6], (N_LAYERS - 1, HIDDEN, HIDDEN)),
        rs_res_b=init(ks[7], (N_LAYERS - 1, HIDDEN)),
        rs_skip_w=init(ks[8], (N_LAYERS, HIDDEN, HIDDEN)),
        rs_skip_b=init(ks[9], (N_LAYERS, HIDDEN)),
        proj_w=init(ks[10], (HIDDEN, OUT_CH)),
        proj_b=init(ks[11], (1, OUT_CH)),
        gamma=jnp.ones((1, OUT_CH), jnp.float32),
        beta=jnp.zeros((1, OUT_CH), jnp.float32),
    )


if __name__ == "__main__":
    key = jax.random.PRNGKey(0)
    k_x, k_p = jax.random.split(key)
    x = jax.random.normal(k_x, (B, IN_CH, T), jnp.float32)            # PyTorch NCT layout
    x_lengths = jnp.array([T, 11], dtype=jnp.int32)
    params = make_params(k_p)

    out = jax.block_until_ready(wn_encoder(x, x_lengths, params))
    ref = jax.block_until_ready(wn_encoder_ref(x, x_lengths, params))

    assert out.shape == (B, OUT_CH, T)
    assert jnp.max(jnp.abs(out - ref)) < 2e-3, "mismatch vs pure-JAX reference"

    print("KERNEL_OK")
</pallas_src>

<mosaic_0001>
module attributes {stable_mosaic.version = 11 : i64} {
  func.func @wn_encoder_kernel(%arg0: i32, %arg1: memref<2xi32, #tpu.memory_space<smem>>, %arg2: memref<16x4xf32, #tpu.memory_space<vmem>>, %arg3: memref<4x32xf32, #tpu.memory_space<vmem>>, %arg4: memref<1x32xf32, #tpu.memory_space<vmem>>, %arg5: memref<4x5x32x32xf32, #tpu.memory_space<vmem>>, %arg6: memref<4x5x32x32xf32, #tpu.memory_space<vmem>>, %arg7: memref<4x32xf32, #tpu.memory_space<vmem>>, %arg8: memref<4x32xf32, #tpu.memory_space<vmem>>, %arg9: memref<3x32x32xf32, #tpu.memory_space<vmem>>, %arg10: memref<3x32xf32, #tpu.memory_space<vmem>>, %arg11: memref<4x32x32xf32, #tpu.memory_space<vmem>>, %arg12: memref<4x32xf32, #tpu.memory_space<vmem>>, %arg13: memref<32x4xf32, #tpu.memory_space<vmem>>, %arg14: memref<1x4xf32, #tpu.memory_space<vmem>>, %arg15: memref<1x4xf32, #tpu.memory_space<vmem>>, %arg16: memref<1x4xf32, #tpu.memory_space<vmem>>, %arg17: memref<16x4xf32, #tpu.memory_space<vmem>>, %arg18: memref<48x32xf32, #tpu.memory_space<vmem>>) attributes {dimension_semantics = [#tpu.dimension_semantics<parallel>], iteration_bounds = array<i64: 2>, scalar_prefetch = 1 : i64, scratch_operands = 1 : i64, tpu.core_type = #tpu.core_type<tc>, window_params = [{transform_indices = @transform_0, window_bounds = array<i64: 16, 4>}, {pipeline_mode = #tpu.pipeline_mode<synchronous>, transform_indices = @transform_1, window_bounds = array<i64: 4, 32>}, {pipeline_mode = #tpu.pipeline_mode<synchronous>, transform_indices = @transform_2, window_bounds = array<i64: 1, 32>}, {pipeline_mode = #tpu.pipeline_mode<synchronous>, transform_indices = @transform_3, window_bounds = array<i64: 4, 5, 32, 32>}, {pipeline_mode = #tpu.pipeline_mode<synchronous>, transform_indices = @transform_4, window_bounds = array<i64: 4, 5, 32, 32>}, {pipeline_mode = #tpu.pipeline_mode<synchronous>, transform_indices = @transform_5, window_bounds = array<i64: 4, 32>}, {pipeline_mode = #tpu.pipeline_mode<synchronous>, transform_indices = @transform_6, window_bounds = array<i64: 4, 32>}, {pipeline_mode = #tpu.pipeline_mode<synchronous>, transform_indices = @transform_7, window_bounds = array<i64: 3, 32, 32>}, {pipeline_mode = #tpu.pipeline_mode<synchronous>, transform_indices = @transform_8, window_bounds = array<i64: 3, 32>}, {pipeline_mode = #tpu.pipeline_mode<synchronous>, transform_indices = @transform_9, window_bounds = array<i64: 4, 32, 32>}, {pipeline_mode = #tpu.pipeline_mode<synchronous>, transform_indices = @transform_10, window_bounds = array<i64: 4, 32>}, {pipeline_mode = #tpu.pipeline_mode<synchronous>, transform_indices = @transform_11, window_bounds = array<i64: 32, 4>}, {pipeline_mode = #tpu.pipeline_mode<synchronous>, transform_indices = @transform_12, window_bounds = array<i64: 1, 4>}, {pipeline_mode = #tpu.pipeline_mode<synchronous>, transform_indices = @transform_13, window_bounds = array<i64: 1, 4>}, {pipeline_mode = #tpu.pipeline_mode<synchronous>, transform_indices = @transform_14, window_bounds = array<i64: 1, 4>}, {transform_indices = @transform_15, window_bounds = array<i64: 16, 4>}]} {
    %0 = arith.index_cast %arg0 : i32 to index
    %1 = memref.load %arg1[%0] : memref<2xi32, #tpu.memory_space<smem>>
    %2 = tpu.iota {dimensions = array<i32: 0>} : vector<16x1xi32>
    %3 = vector.broadcast %1 : i32 to vector<16x1xi32>
    %4 = arith.cmpi slt, %2, %3 : vector<16x1xi32>
    %5 = arith.extui %4 : vector<16x1xi1> to vector<16x1xi32>
    %6 = arith.sitofp %5 : vector<16x1xi32> to vector<16x1xf32>
    %7 = vector.shape_cast %6 : vector<16x1xf32> to vector<16x1xf32>
    %8 = vector.broadcast %7 : vector<16x1xf32> to vector<16x32xf32>
    %9 = vector.shape_cast %6 : vector<16x1xf32> to vector<16x1xf32>
    %10 = vector.broadcast %9 : vector<16x1xf32> to vector<16x4xf32>
    %c0 = arith.constant 0 : index
    %c0_0 = arith.constant 0 : index
    %11 = vector.load %arg2[%c0, %c0_0] : memref<16x4xf32, #tpu.memory_space<vmem>>, vector<16x4xf32>
    %c0_1 = arith.constant 0 : index
    %c0_2 = arith.constant 0 : index
    %12 = vector.load %arg3[%c0_1, %c0_2] : memref<4x32xf32, #tpu.memory_space<vmem>>, vector<4x32xf32>
    %cst = arith.constant dense<0.000000e+00> : vector<16x32xf32>
    %13 = tpu.matmul %11, %12, %cst {dimension_numbers = #tpu.dot_dimension_numbers<[1], [0], [0], [1], [0, 0, 1, 1], [], []>} : vector<16x4xf32>, vector<4x32xf32>, vector<16x32xf32> -> vector<16x32xf32>
    %c0_3 = arith.constant 0 : index
    %c0_4 = arith.constant 0 : index
    %14 = vector.load %arg4[%c0_3, %c0_4] : memref<1x32xf32, #tpu.memory_space<vmem>>, vector<1x32xf32>
    %15 = vector.broadcast %14 : vector<1x32xf32> to vector<16x32xf32>
    %16 = arith.addf %13, %15 : vector<16x32xf32>
    %17 = arith.mulf %16, %8 : vector<16x32xf32>
    %cst_5 = arith.constant 0.000000e+00 : f32
    %18 = vector.broadcast %cst_5 : f32 to vector<16x32xf32>
    %c0_6 = arith.constant 0 : index
    %c0_7 = arith.constant 0 : index
    %19 = vector.load %arg18[%c0_6, %c0_7] : memref<48x32xf32, #tpu.memory_space<vmem>>, vector<16x32xf32>
    tpu.vector_store %arg18[%c0_6, %c0_7], %18 {strides = array<i32>} : memref<48x32xf32, #tpu.memory_space<vmem>>, vector<16x32xf32>,
    %c32 = arith.constant 32 : index
    %c0_8 = arith.constant 0 : index
    %20 = vector.load %arg18[%c32, %c0_8] : memref<48x32xf32, #tpu.memory_space<vmem>>, vector<16x32xf32>
    tpu.vector_store %arg18[%c32, %c0_8], %18 {strides = array<i32>} : memref<48x32xf32, #tpu.memory_space<vmem>>, vector<16x32xf32>,
    %c16 = arith.constant 16 : index
    %c0_9 = arith.constant 0 : index
    %21 = vector.load %arg18[%c16, %c0_9] : memref<48x32xf32, #tpu.memory_space<vmem>>, vector<16x32xf32>
    tpu.vector_store %arg18[%c16, %c0_9], %17 {strides = array<i32>} : memref<48x32xf32, #tpu.memory_space<vmem>>, vector<16x32xf32>,
    %cst_10 = arith.constant 0.000000e+00 : f32
    %22 = vector.broadcast %cst_10 : f32 to vector<16x32xf32>
    %cst_11 = arith.constant 0.000000e+00 : f32
    %23 = vector.broadcast %cst_11 : f32 to vector<16x32xf32>
    %cst_12 = arith.constant 0.000000e+00 : f32
    %24 = vector.broadcast %cst_12 : f32 to vector<16x32xf32>
    %c14 = arith.constant 14 : index
    %c0_13 = arith.constant 0 : index
    %25 = vector.load %arg18[%c14, %c0_13] : memref<48x32xf32, #tpu.memory_space<vmem>>, vector<16x32xf32>
    %c0_14 = arith.constant 0 : index
    %c0_15 = arith.constant 0 : index
    %c0_16 = arith.constant 0 : index
    %c0_17 = arith.constant 0 : index
    %26 = vector.load %arg5[%c0_14, %c0_15, %c0_16, %c0_17] : memref<4x5x32x32xf32, #tpu.memory_space<vmem>>, vector<1x1x32x32xf32>
    %27 = vector.shape_cast %26 : vector<1x1x32x32xf32> to vector<32x32xf32>
    %cst_18 = arith.constant dense<0.000000e+00> : vector<16x32xf32>
    %28 = tpu.matmul %25, %27, %cst_18 {dimension_numbers = #tpu.dot_dimension_numbers<[1], [0], [0], [1], [0, 0, 1, 1], [], []>} : vector<16x32xf32>, vector<32x32xf32>, vector<16x32xf32> -> vector<16x32xf32>
    %29 = arith.addf %23, %28 : vector<16x32xf32>
    %c0_19 = arith.constant 0 : index
    %c0_20 = arith.constant 0 : index
    %c0_21 = arith.constant 0 : index
    %c0_22 = arith.constant 0 : index
    %30 = vector.load %arg6[%c0_19, %c0_20, %c0_21, %c0_22] : memref<4x5x32x32xf32, #tpu.memory_space<vmem>>, vector<1x1x32x32xf32>
    %31 = vector.shape_cast %30 : vector<1x1x32x32xf32> to vector<32x32xf32>
    %cst_23 = arith.constant dense<0.000000e+00> : vector<16x32xf32>
    %32 = tpu.matmul %25, %31, %cst_23 {dimension_numbers = #tpu.dot_dimension_numbers<[1], [0], [0], [1], [0, 0, 1, 1], [], []>} : vector<16x32xf32>, vector<32x32xf32>, vector<16x32xf32> -> vector<16x32xf32>
    %33 = arith.addf %24, %32 : vector<16x32xf32>
    %c15 = arith.constant 15 : index
    %c0_24 = arith.constant 0 : index
    %34 = vector.load %arg18[%c15, %c0_24] : memref<48x32xf32, #tpu.memory_space<vmem>>, vector<16x32xf32>
    %c0_25 = arith.constant 0 : index
    %c1 = arith.constant 1 : index
    %c0_26 = arith.constant 0 : index
    %c0_27 = arith.constant 0 : index
    %35 = vector.load %arg5[%c0_25, %c1, %c0_26, %c0_27] : memref<4x5x32x32xf32, #tpu.memory_space<vmem>>, vector<1x1x32x32xf32>
    %36 = vector.shape_cast %35 : vector<1x1x32x32xf32> to vector<32x32xf32>
    %cst_28 = arith.constant dense<0.000000e+00> : vector<16x32xf32>
    %37 = tpu.matmul %34, %36, %cst_28 {dimension_numbers = #tpu.dot_dimension_numbers<[1], [0], [0], [1], [0, 0, 1, 1], [], []>} : vector<16x32xf32>, vector<32x32xf32>, vector<16x32xf32> -> vector<16x32xf32>
    %38 = arith.addf %29, %37 : vector<16x32xf32>
    %c0_29 = arith.constant 0 : index
    %c1_30 = arith.constant 1 : index
    %c0_31 = arith.constant 0 : index
    %c0_32 = arith.constant 0 : index
    %39 = vector.load %arg6[%c0_29, %c1_30, %c0_31, %c0_32] : memref<4x5x32x32xf32, #tpu.memory_space<vmem>>, vector<1x1x32x32xf32>
    %40 = vector.shape_cast %39 : vector<1x1x32x32xf32> to vector<32x32xf32>
    %cst_33 = arith.constant dense<0.000000e+00> : vector<16x32xf32>
    %41 = tpu.matmul %34, %40, %cst_33 {dimension_numbers = #tpu.dot_dimension_numbers<[1], [0], [0], [1], [0, 0, 1, 1], [], []>} : vector<16x32xf32>, vector<32x32xf32>, vector<16x32xf32> -> vector<16x32xf32>
    %42 = arith.addf %33, %41 : vector<16x32xf32>
    %c16_34 = arith.constant 16 : index
    %c0_35 = arith.constant 0 : index
    %43 = vector.load %arg18[%c16_34, %c0_35] : memref<48x32xf32, #tpu.memory_space<vmem>>, vector<16x32xf32>
    %c0_36 = arith.constant 0 : index
    %c2 = arith.constant 2 : index
    %c0_37 = arith.constant 0 : index
    %c0_38 = arith.constant 0 : index
    %44 = vector.load %arg5[%c0_36, %c2, %c0_37, %c0_38] : memref<4x5x32x32xf32, #tpu.memory_space<vmem>>, vector<1x1x32x32xf32>
    %45 = vector.shape_cast %44 : vector<1x1x32x32xf32> to vector<32x32xf32>
    %cst_39 = arith.constant dense<0.000000e+00> : vector<16x32xf32>
    %46 = tpu.matmul %43, %45, %cst_39 {dimension_numbers = #tpu.dot_dimension_numbers<[1], [0], [0], [1], [0, 0, 1, 1], [], []>} : vector<16x32xf32>, vector<32x32xf32>, vector<16x32xf32> -> vector<16x32xf32>
    %47 = arith.addf %38, %46 : vector<16x32xf32>
    %c0_40 = arith.constant 0 : index
    %c2_41 = arith.constant 2 : index
    %c0_42 = arith.constant 0 : index
    %c0_43 = arith.constant 0 : index
    %48 = vector.load %arg6[%c0_40, %c2_41, %c0_42, %c0_43] : memref<4x5x32x32xf32, #tpu.memory_space<vmem>>, vector<1x1x32x32xf32>
    %49 = vector.shape_cast %48 : vector<1x1x32x32xf32> to vector<32x32xf32>
    %cst_44 = arith.constant dense<0.000000e+00> : vector<16x32xf32>
    %50 = tpu.matmul %43, %49, %cst_44 {dimension_numbers = #tpu.dot_dimension_numbers<[1], [0], [0], [1], [0, 0, 1, 1], [], []>} : vector<16x32xf32>, vector<32x32xf32>, vector<16x32xf32> -> vector<16x32xf32>
    %51 = arith.addf %42, %50 : vector<16x32xf32>
    %c17 = arith.constant 17 : index
    %c0_45 = arith.constant 0 : index
    %52 = vector.load %arg18[%c17, %c0_45] : memref<48x32xf32, #tpu.memory_space<vmem>>, vector<16x32xf32>
    %c0_46 = arith.constant 0 : index
    %c3 = arith.constant 3 : index
    %c0_47 = arith.constant 0 : index
    %c0_48 = arith.constant 0 : index
    %53 = vector.load %arg5[%c0_46, %c3, %c0_47, %c0_48] : memref<4x5x32x32xf32, #tpu.memory_space<vmem>>, vector<1x1x32x32xf32>
    %54 = vector.shape_cast %53 : vector<1x1x32x32xf32> to vector<32x32xf32>
    %cst_49 = arith.constant dense<0.000000e+00> : vector<16x32xf32>
    %55 = tpu.matmul %52, %54, %cst_49 {dimension_numbers = #tpu.dot_dimension_numbers<[1], [0], [0], [1], [0, 0, 1, 1], [], []>} : vector<16x32xf32>, vector<32x32xf32>, vector<16x32xf32> -> vector<16x32xf32>
    %56 = arith.addf %47, %55 : vector<16x32xf32>
    %c0_50 = arith.constant 0 : index
    %c3_51 = arith.constant 3 : index
    %c0_52 = arith.constant 0 : index
    %c0_53 = arith.constant 0 : index
    %57 = vector.load %arg6[%c0_50, %c3_51, %c0_52, %c0_53] : memref<4x5x32x32xf32, #tpu.memory_space<vmem>>, vector<1x1x32x32xf32>
    %58 = vector.shape_cast %57 : vector<1x1x32x32xf32> to vector<32x32xf32>
    %cst_54 = arith.constant dense<0.000000e+00> : vector<16x32xf32>
    %59 = tpu.matmul %52, %58, %cst_54 {dimension_numbers = #tpu.dot_dimension_numbers<[1], [0], [0], [1], [0, 0, 1, 1], [], []>} : vector<16x32xf32>, vector<32x32xf32>, vector<16x32xf32> -> vector<16x32xf32>
    %60 = arith.addf %51, %59 : vector<16x32xf32>
    %c18 = arith.constant 18 : index
    %c0_55 = arith.constant 0 : index
    %61 = vector.load %arg18[%c18, %c0_55] : memref<48x32xf32, #tpu.memory_space<vmem>>, vector<16x32xf32>
    %c0_56 = arith.constant 0 : index
    %c4 = arith.constant 4 : index
    %c0_57 = arith.constant 0 : index
    %c0_58 = arith.constant 0 : index
    %62 = vector.load %arg5[%c0_56, %c4, %c0_57, %c0_58] : memref<4x5x32x32xf32, #tpu.memory_space<vmem>>, vector<1x1x32x32xf32>
    %63 = vector.shape_cast %62 : vector<1x1x32x32xf32> to vector<32x32xf32>
    %cst_59 = arith.constant dense<0.000000e+00> : vector<16x32xf32>
    %64 = tpu.matmul %61, %63, %cst_59 {dimension_numbers = #tpu.dot_dimension_numbers<[1], [0], [0], [1], [0, 0, 1, 1], [], []>} : vector<16x32xf32>, vector<32x32xf32>, vector<16x32xf32> -> vector<16x32xf32>
    %65 = arith.addf %56, %64 : vector<16x32xf32>
    %c0_60 = arith.constant 0 : index
    %c4_61 = arith.constant 4 : index
    %c0_62 = arith.constant 0 : index
    %c0_63 = arith.constant 0 : index
    %66 = vector.load %arg6[%c0_60, %c4_61, %c0_62, %c0_63] : memref<4x5x32x32xf32, #tpu.memory_space<vmem>>, vector<1x1x32x32xf32>
    %67 = vector.shape_cast %66 : vector<1x1x32x32xf32> to vector<32x32xf32>
    %cst_64 = arith.constant dense<0.000000e+00> : vector<16x32xf32>
    %68 = tpu.matmul %61, %67, %cst_64 {dimension_numbers = #tpu.dot_dimension_numbers<[1], [0], [0], [1], [0, 0, 1, 1], [], []>} : vector<16x32xf32>, vector<32x32xf32>, vector<16x32xf32> -> vector<16x32xf32>
    %69 = arith.addf %60, %68 : vector<16x32xf32>
    %c0_65 = arith.constant 0 : index
    %c0_66 = arith.constant 0 : index
    %70 = vector.load %arg7[%c0_65, %c0_66] : memref<4x32xf32, #tpu.memory_space<vmem>>, vector<1x32xf32>
    %71 = vector.broadcast %70 : vector<1x32xf32> to vector<16x32xf32>
    %72 = arith.addf %65, %71 : vector<16x32xf32>
    %73 = math.tanh %72 : vector<16x32xf32>
    %c0_67 = arith.constant 0 : index
    %c0_68 = arith.constant 0 : index
    %74 = vector.load %arg8[%c0_67, %c0_68] : memref<4x32xf32, #tpu.memory_space<vmem>>, vector<1x32xf32>
    %75 = vector.broadcast %74 : vector<1x32xf32> to vector<16x32xf32>
    %76 = arith.addf %69, %75 : vector<16x32xf32>
    %77 = arith.negf %76 : vector<16x32xf32>
    %78 = math.exp %77 : vector<16x32xf32>
    %cst_69 = arith.constant 1.000000e+00 : f32
    %79 = vector.broadcast %cst_69 : f32 to vector<16x32xf32>
    %80 = arith.addf %79, %78 : vector<16x32xf32>
    %81 = arith.divf %79, %80 : vector<16x32xf32>
    %82 = arith.mulf %73, %81 : vector<16x32xf32>
    %c0_70 = arith.constant 0 : index
    %c0_71 = arith.constant 0 : index
    %c0_72 = arith.constant 0 : index
    %83 = vector.load %arg11[%c0_70, %c0_71, %c0_72] : memref<4x32x32xf32, #tpu.memory_space<vmem>>, vector<1x32x32xf32>
    %84 = vector.shape_cast %83 : vector<1x32x32xf32> to vector<32x32xf32>
    %cst_73 = arith.constant dense<0.000000e+00> : vector<16x32xf32>
    %85 = tpu.matmul %82, %84, %cst_73 {dimension_numbers = #tpu.dot_dimension_numbers<[1], [0], [0], [1], [0, 0, 1, 1], [], []>} : vector<16x32xf32>, vector<32x32xf32>, vector<16x32xf32> -> vector<16x32xf32>
    %c0_74 = arith.constant 0 : index
    %c0_75 = arith.constant 0 : index
    %86 = vector.load %arg12[%c0_74, %c0_75] : memref<4x32xf32, #tpu.memory_space<vmem>>, vector<1x32xf32>
    %87 = vector.broadcast %86 : vector<1x32xf32> to vector<16x32xf32>
    %88 = arith.addf %85, %87 : vector<16x32xf32>
    %89 = arith.addf %22, %88 : vector<16x32xf32>
    %c0_76 = arith.constant 0 : index
    %c0_77 = arith.constant 0 : index
    %c0_78 = arith.constant 0 : index
    %90 = vector.load %arg9[%c0_76, %c0_77, %c0_78] : memref<3x32x32xf32, #tpu.memory_space<vmem>>, vector<1x32x32xf32>
    %91 = vector.shape_cast %90 : vector<1x32x32xf32> to vector<32x32xf32>
    %cst_79 = arith.constant dense<0.000000e+00> : vector<16x32xf32>
    %92 = tpu.matmul %82, %91, %cst_79 {dimension_numbers = #tpu.dot_dimension_numbers<[1], [0], [0], [1], [0, 0, 1, 1], [], []>} : vector<16x32xf32>, vector<32x32xf32>, vector<16x32xf32> -> vector<16x32xf32>
    %c0_80 = arith.constant 0 : index
    %c0_81 = arith.constant 0 : index
    %93 = vector.load %arg10[%c0_80, %c0_81] : memref<3x32xf32, #tpu.memory_space<vmem>>, vector<1x32xf32>
    %94 = vector.broadcast %93 : vector<1x32xf32> to vector<16x32xf32>
    %95 = arith.addf %92, %94 : vector<16x32xf32>
    %96 = arith.addf %17, %95 : vector<16x32xf32>
    %97 = arith.mulf %96, %8 : vector<16x32xf32>
    %c16_82 = arith.constant 16 : index
    %c0_83 = arith.constant 0 : index
    %98 = vector.load %arg18[%c16_82, %c0_83] : memref<48x32xf32, #tpu.memory_space<vmem>>, vector<16x32xf32>
    tpu.vector_store %arg18[%c16_82, %c0_83], %97 {strides = array<i32>} : memref<48x32xf32, #tpu.memory_space<vmem>>, vector<16x32xf32>,
    %cst_84 = arith.constant 0.000000e+00 : f32
    %99 = vector.broadcast %cst_84 : f32 to vector<16x32xf32>
    %cst_85 = arith.constant 0.000000e+00 : f32
    %100 = vector.broadcast %cst_85 : f32 to vector<16x32xf32>
    %c12 = arith.constant 12 : index
    %c0_86 = arith.constant 0 : index
    %101 = vector.load %arg18[%c12, %c0_86] : memref<48x32xf32, #tpu.memory_space<vmem>>, vector<16x32xf32>
    %c1_87 = arith.constant 1 : index
    %c0_88 = arith.constant 0 : index
    %c0_89 = arith.constant 0 : index
    %c0_90 = arith.constant 0 : index
    %102 = vector.load %arg5[%c1_87, %c0_88, %c0_89, %c0_90] : memref<4x5x32x32xf32, #tpu.memory_space<vmem>>, vector<1x1x32x32xf32>
    %103 = vector.shape_cast %102 : vector<1x1x32x32xf32> to vector<32x32xf32>
    %cst_91 = arith.constant dense<0.000000e+00> : vector<16x32xf32>
    %104 = tpu.matmul %101, %103, %cst_91 {dimension_numbers = #tpu.dot_dimension_numbers<[1], [0], [0], [1], [0, 0, 1, 1], [], []>} : vector<16x32xf32>, vector<32x32xf32>, vector<16x32xf32> -> vector<16x32xf32>
    %105 = arith.addf %99, %104 : vector<16x32xf32>
    %c1_92 = arith.constant 1 : index
    %c0_93 = arith.constant 0 : index
    %c0_94 = arith.constant 0 : index
    %c0_95 = arith.constant 0 : index
    %106 = vector.load %arg6[%c1_92, %c0_93, %c0_94, %c0_95] : memref<4x5x32x32xf32, #tpu.memory_space<vmem>>, vector<1x1x32x32xf32>
    %107 = vector.shape_cast %106 : vector<1x1x32x32xf32> to vector<32x32xf32>
    %cst_96 = arith.constant dense<0.000000e+00> : vector<16x32xf32>
    %108 = tpu.matmul %101, %107, %cst_96 {dimension_numbers = #tpu.dot_dimension_numbers<[1], [0], [0], [1], [0, 0, 1, 1], [], []>} : vector<16x32xf32>, vector<32x32xf32>, vector<16x32xf32> -> vector<16x32xf32>
    %109 = arith.addf %100, %108 : vector<16x32xf32>
    %c14_97 = arith.constant 14 : index
    %c0_98 = arith.constant 0 : index
    %110 = vector.load %arg18[%c14_97, %c0_98] : memref<48x32xf32, #tpu.memory_space<vmem>>, vector<16x32xf32>
    %c1_99 = arith.constant 1 : index
    %c1_100 = arith.constant 1 : index
    %c0_101 = arith.constant 0 : index
    %c0_102 = arith.constant 0 : index
    %111 = vector.load %arg5[%c1_99, %c1_100, %c0_101, %c0_102] : memref<4x5x32x32xf32, #tpu.memory_space<vmem>>, vector<1x1x32x32xf32>
    %112 = vector.shape_cast %111 : vector<1x1x32x32xf32> to vector<32x32xf32>
    %cst_103 = arith.constant dense<0.000000e+00> : vector<16x32xf32>
    %113 = tpu.matmul %110, %112, %cst_103 {dimension_numbers = #tpu.dot_dimension_numbers<[1], [0], [0], [1], [0, 0, 1, 1], [], []>} : vector<16x32xf32>, vector<32x32xf32>, vector<16x32xf32> -> vector<16x32xf32>
    %114 = arith.addf %105, %113 : vector<16x32xf32>
    %c1_104 = arith.constant 1 : index
    %c1_105 = arith.constant 1 : index
    %c0_106 = arith.constant 0 : index
    %c0_107 = arith.constant 0 : index
    %115 = vector.load %arg6[%c1_104, %c1_105, %c0_106, %c0_107] : memref<4x5x32x32xf32, #tpu.memory_space<vmem>>, vector<1x1x32x32xf32>
    %116 = vector.shape_cast %115 : vector<1x1x32x32xf32> to vector<32x32xf32>
    %cst_108 = arith.constant dense<0.000000e+00> : vector<16x32xf32>
    %117 = tpu.matmul %110, %116, %cst_108 {dimension_numbers = #tpu.dot_dimension_numbers<[1], [0], [0], [1], [0, 0, 1, 1], [], []>} : vector<16x32xf32>, vector<32x32xf32>, vector<16x32xf32> -> vector<16x32xf32>
    %118 = arith.addf %109, %117 : vector<16x32xf32>
    %c16_109 = arith.constant 16 : index
    %c0_110 = arith.constant 0 : index
    %119 = vector.load %arg18[%c16_109, %c0_110] : memref<48x32xf32, #tpu.memory_space<vmem>>, vector<16x32xf32>
    %c1_111 = arith.constant 1 : index
    %c2_112 = arith.constant 2 : index
    %c0_113 = arith.constant 0 : index
    %c0_114 = arith.constant 0 : index
    %120 = vector.load %arg5[%c1_111, %c2_112, %c0_113, %c0_114] : memref<4x5x32x32xf32, #tpu.memory_space<vmem>>, vector<1x1x32x32xf32>
    %121 = vector.shape_cast %120 : vector<1x1x32x32xf32> to vector<32x32xf32>
    %cst_115 = arith.constant dense<0.000000e+00> : vector<16x32xf32>
    %122 = tpu.matmul %119, %121, %cst_115 {dimension_numbers = #tpu.dot_dimension_numbers<[1], [0], [0], [1], [0, 0, 1, 1], [], []>} : vector<16x32xf32>, vector<32x32xf32>, vector<16x32xf32> -> vector<16x32xf32>
    %123 = arith.addf %114, %122 : vector<16x32xf32>
    %c1_116 = arith.constant 1 : index
    %c2_117 = arith.constant 2 : index
    %c0_118 = arith.constant 0 : index
    %c0_119 = arith.constant 0 : index
    %124 = vector.load %arg6[%c1_116, %c2_117, %c0_118, %c0_119] : memref<4x5x32x32xf32, #tpu.memory_space<vmem>>, vector<1x1x32x32xf32>
    %125 = vector.shape_cast %124 : vector<1x1x32x32xf32> to vector<32x32xf32>
    %cst_120 = arith.constant dense<0.000000e+00> : vector<16x32xf32>
    %126 = tpu.matmul %119, %125, %cst_120 {dimension_numbers = #tpu.dot_dimension_numbers<[1], [0], [0], [1], [0, 0, 1, 1], [], []>} : vector<16x32xf32>, vector<32x32xf32>, vector<16x32xf32> -> vector<16x32xf32>
    %127 = arith.addf %118, %126 : vector<16x32xf32>
    %c18_121 = arith.constant 18 : index
    %c0_122 = arith.constant 0 : index
    %128 = vector.load %arg18[%c18_121, %c0_122] : memref<48x32xf32, #tpu.memory_space<vmem>>, vector<16x32xf32>
    %c1_123 = arith.constant 1 : index
    %c3_124 = arith.constant 3 : index
    %c0_125 = arith.constant 0 : index
    %c0_126 = arith.constant 0 : index
    %129 = vector.load %arg5[%c1_123, %c3_124, %c0_125, %c0_126] : memref<4x5x32x32xf32, #tpu.memory_space<vmem>>, vector<1x1x32x32xf32>
    %130 = vector.shape_cast %129 : vector<1x1x32x32xf32> to vector<32x32xf32>
    %cst_127 = arith.constant dense<0.000000e+00> : vector<16x32xf32>
    %131 = tpu.matmul %128, %130, %cst_127 {dimension_numbers = #tpu.dot_dimension_numbers<[1], [0], [0], [1], [0, 0, 1, 1], [], []>} : vector<16x32xf32>, vector<32x32xf32>, vector<16x32xf32> -> vector<16x32xf32>
    %132 = arith.addf %123, %131 : vector<16x32xf32>
    %c1_128 = arith.constant 1 : index
    %c3_129 = arith.constant 3 : index
    %c0_130 = arith.constant 0 : index
    %c0_131 = arith.constant 0 : index
    %133 = vector.load %arg6[%c1_128, %c3_129, %c0_130, %c0_131] : memref<4x5x32x32xf32, #tpu.memory_space<vmem>>, vector<1x1x32x32xf32>
    %134 = vector.shape_cast %133 : vector<1x1x32x32xf32> to vector<32x32xf32>
    %cst_132 = arith.constant dense<0.000000e+00> : vector<16x32xf32>
    %135 = tpu.matmul %128, %134, %cst_132 {dimension_numbers = #tpu.dot_dimension_numbers<[1], [0], [0], [1], [0, 0, 1, 1], [], []>} : vector<16x32xf32>, vector<32x32xf32>, vector<16x32xf32> -> vector<16x32xf32>
    %136 = arith.addf %127, %135 : vector<16x32xf32>
    %c20 = arith.constant 20 : index
    %c0_133 = arith.constant 0 : index
    %137 = vector.load %arg18[%c20, %c0_133] : memref<48x32xf32, #tpu.memory_space<vmem>>, vector<16x32xf32>
    %c1_134 = arith.constant 1 : index
    %c4_135 = arith.constant 4 : index
    %c0_136 = arith.constant 0 : index
    %c0_137 = arith.constant 0 : index
    %138 = vector.load %arg5[%c1_134, %c4_135, %c0_136, %c0_137] : memref<4x5x32x32xf32, #tpu.memory_space<vmem>>, vector<1x1x32x32xf32>
    %139 = vector.shape_cast %138 : vector<1x1x32x32xf32> to vector<32x32xf32>
    %cst_138 = arith.constant dense<0.000000e+00> : vector<16x32xf32>
    %140 = tpu.matmul %137, %139, %cst_138 {dimension_numbers = #tpu.dot_dimension_numbers<[1], [0], [0], [1], [0, 0, 1, 1], [], []>} : vector<16x32xf32>, vector<32x32xf32>, vector<16x32xf32> -> vector<16x32xf32>
    %141 = arith.addf %132, %140 : vector<16x32xf32>
    %c1_139 = arith.constant 1 : index
    %c4_140 = arith.constant 4 : index
    %c0_141 = arith.constant 0 : index
    %c0_142 = arith.constant 0 : index
    %142 = vector.load %arg6[%c1_139, %c4_140, %c0_141, %c0_142] : memref<4x5x32x32xf32, #tpu.memory_space<vmem>>, vector<1x1x32x32xf32>
    %143 = vector.shape_cast %142 : vector<1x1x32x32xf32> to vector<32x32xf32>
    %cst_143 = arith.constant dense<0.000000e+00> : vector<16x32xf32>
    %144 = tpu.matmul %137, %143, %cst_143 {dimension_numbers = #tpu.dot_dimension_numbers<[1], [0], [0], [1], [0, 0, 1, 1], [], []>} : vector<16x32xf32>, vector<32x32xf32>, vector<16x32xf32> -> vector<16x32xf32>
    %145 = arith.addf %136, %144 : vector<16x32xf32>
    %c1_144 = arith.constant 1 : index
    %c0_145 = arith.constant 0 : index
    %146 = vector.load %arg7[%c1_144, %c0_145] : memref<4x32xf32, #tpu.memory_space<vmem>>, vector<1x32xf32>
    %147 = vector.broadcast %146 : vector<1x32xf32> to vector<16x32xf32>
    %148 = arith.addf %141, %147 : vector<16x32xf32>
    %149 = math.tanh %148 : vector<16x32xf32>
    %c1_146 = arith.constant 1 : index
    %c0_147 = arith.constant 0 : index
    %150 = vector.load %arg8[%c1_146, %c0_147] : memref<4x32xf32, #tpu.memory_space<vmem>>, vector<1x32xf32>
    %151 = vector.broadcast %150 : vector<1x32xf32> to vector<16x32xf32>
    %152 = arith.addf %145, %151 : vector<16x32xf32>
    %153 = arith.negf %152 : vector<16x32xf32>
    %154 = math.exp %153 : vector<16x32xf32>
    %cst_148 = arith.constant 1.000000e+00 : f32
    %155 = vector.broadcast %cst_148 : f32 to vector<16x32xf32>
    %156 = arith.addf %155, %154 : vector<16x32xf32>
    %157 = arith.divf %155, %156 : vector<16x32xf32>
    %158 = arith.mulf %149, %157 : vector<16x32xf32>
    %c1_149 = arith.constant 1 : index
    %c0_150 = arith.constant 0 : index
    %c0_151 = arith.constant 0 : index
    %159 = vector.load %arg11[%c1_149, %c0_150, %c0_151] : memref<4x32x32xf32, #tpu.memory_space<vmem>>, vector<1x32x32xf32>
    %160 = vector.shape_cast %159 : vector<1x32x32xf32> to vector<32x32xf32>
    %cst_152 = arith.constant dense<0.000000e+00> : vector<16x32xf32>
    %161 = tpu.matmul %158, %160, %cst_152 {dimension_numbers = #tpu.dot_dimension_numbers<[1], [0], [0], [1], [0, 0, 1, 1], [], []>} : vector<16x32xf32>, vector<32x32xf32>, vector<16x32xf32> -> vector<16x32xf32>
    %c1_153 = arith.constant 1 : index
    %c0_154 = arith.constant 0 : index
    %162 = vector.load %arg12[%c1_153, %c0_154] : memref<4x32xf32, #tpu.memory_space<vmem>>, vector<1x32xf32>
    %163 = vector.broadcast %162 : vector<1x32xf32> to vector<16x32xf32>
    %164 = arith.addf %161, %163 : vector<16x32xf32>
    %165 = arith.addf %89, %164 : vector<16x32xf32>
    %c1_155 = arith.constant 1 : index
    %c0_156 = arith.constant 0 : index
    %c0_157 = arith.constant 0 : index
    %166 = vector.load %arg9[%c1_155, %c0_156, %c0_157] : memref<3x32x32xf32, #tpu.memory_space<vmem>>, vector<1x32x32xf32>
    %167 = vector.shape_cast %166 : vector<1x32x32xf32> to vector<32x32xf32>
    %cst_158 = arith.constant dense<0.000000e+00> : vector<16x32xf32>
    %168 = tpu.matmul %158, %167, %cst_158 {dimension_numbers = #tpu.dot_dimension_numbers<[1], [0], [0], [1], [0, 0, 1, 1], [], []>} : vector<16x32xf32>, vector<32x32xf32>, vector<16x32xf32> -> vector<16x32xf32>
    %c1_159 = arith.constant 1 : index
    %c0_160 = arith.constant 0 : index
    %169 = vector.load %arg10[%c1_159, %c0_160] : memref<3x32xf32, #tpu.memory_space<vmem>>, vector<1x32xf32>
    %170 = vector.broadcast %169 : vector<1x32xf32> to vector<16x32xf32>
    %171 = arith.addf %168, %170 : vector<16x32xf32>
    %172 = arith.addf %97, %171 : vector<16x32xf32>
    %173 = arith.mulf %172, %8 : vector<16x32xf32>
    %c16_161 = arith.constant 16 : index
    %c0_162 = arith.constant 0 : index
    %174 = vector.load %arg18[%c16_161, %c0_162] : memref<48x32xf32, #tpu.memory_space<vmem>>, vector<16x32xf32>
    tpu.vector_store %arg18[%c16_161, %c0_162], %173 {strides = array<i32>} : memref<48x32xf32, #tpu.memory_space<vmem>>, vector<16x32xf32>,
    %cst_163 = arith.constant 0.000000e+00 : f32
    %175 = vector.broadcast %cst_163 : f32 to vector<16x32xf32>
    %cst_164 = arith.constant 0.000000e+00 : f32
    %176 = vector.broadcast %cst_164 : f32 to vector<16x32xf32>
    %c8 = arith.constant 8 : index
    %c0_165 = arith.constant 0 : index
    %177 = vector.load %arg18[%c8, %c0_165] : memref<48x32xf32, #tpu.memory_space<vmem>>, vector<16x32xf32>
    %c2_166 = arith.constant 2 : index
    %c0_167 = arith.constant 0 : index
    %c0_168 = arith.constant 0 : index
    %c0_169 = arith.constant 0 : index
    %178 = vector.load %arg5[%c2_166, %c0_167, %c0_168, %c0_169] : memref<4x5x32x32xf32, #tpu.memory_space<vmem>>, vector<1x1x32x32xf32>
    %179 = vector.shape_cast %178 : vector<1x1x32x32xf32> to vector<32x32xf32>
    %cst_170 = arith.constant dense<0.000000e+00> : vector<16x32xf32>
    %180 = tpu.matmul %177, %179, %cst_170 {dimension_numbers = #tpu.dot_dimension_numbers<[1], [0], [0], [1], [0, 0, 1, 1], [], []>} : vector<16x32xf32>, vector<32x32xf32>, vector<16x32xf32> -> vector<16x32xf32>
    %181 = arith.addf %175, %180 : vector<16x32xf32>
    %c2_171 = arith.constant 2 : index
    %c0_172 = arith.constant 0 : index
    %c0_173 = arith.constant 0 : index
    %c0_174 = arith.constant 0 : index
    %182 = vector.load %arg6[%c2_171, %c0_172, %c0_173, %c0_174] : memref<4x5x32x32xf32, #tpu.memory_space<vmem>>, vector<1x1x32x32xf32>
    %183 = vector.shape_cast %182 : vector<1x1x32x32xf32> to vector<32x32xf32>
    %cst_175 = arith.constant dense<0.000000e+00> : vector<16x32xf32>
    %184 = tpu.matmul %177, %183, %cst_175 {dimension_numbers = #tpu.dot_dimension_numbers<[1], [0], [0], [1], [0, 0, 1, 1], [], []>} : vector<16x32xf32>, vector<32x32xf32>, vector<16x32xf32> -> vector<16x32xf32>
    %185 = arith.addf %176, %184 : vector<16x32xf32>
    %c12_176 = arith.constant 12 : index
    %c0_177 = arith.constant 0 : index
    %186 = vector.load %arg18[%c12_176, %c0_177] : memref<48x32xf32, #tpu.memory_space<vmem>>, vector<16x32xf32>
    %c2_178 = arith.constant 2 : index
    %c1_179 = arith.constant 1 : index
    %c0_180 = arith.constant 0 : index
    %c0_181 = arith.constant 0 : index
    %187 = vector.load %arg5[%c2_178, %c1_179, %c0_180, %c0_181] : memref<4x5x32x32xf32, #tpu.memory_space<vmem>>, vector<1x1x32x32xf32>
    %188 = vector.shape_cast %187 : vector<1x1x32x32xf32> to vector<32x32xf32>
    %cst_182 = arith.constant dense<0.000000e+00> : vector<16x32xf32>
    %189 = tpu.matmul %186, %188, %cst_182 {dimension_numbers = #tpu.dot_dimension_numbers<[1], [0], [0], [1], [0, 0, 1, 1], [], []>} : vector<16x32xf32>, vector<32x32xf32>, vector<16x32xf32> -> vector<16x32xf32>
    %190 = arith.addf %181, %189 : vector<16x32xf32>
    %c2_183 = arith.constant 2 : index
    %c1_184 = arith.constant 1 : index
    %c0_185 = arith.constant 0 : index
    %c0_186 = arith.constant 0 : index
    %191 = vector.load %arg6[%c2_183, %c1_184, %c0_185, %c0_186] : memref<4x5x32x32xf32, #tpu.memory_space<vmem>>, vector<1x1x32x32xf32>
    %192 = vector.shape_cast %191 : vector<1x1x32x32xf32> to vector<32x32xf32>
    %cst_187 = arith.constant dense<0.000000e+00> : vector<16x32xf32>
    %193 = tpu.matmul %186, %192, %cst_187 {dimension_numbers = #tpu.dot_dimension_numbers<[1], [0], [0], [1], [0, 0, 1, 1], [], []>} : vector<16x32xf32>, vector<32x32xf32>, vector<16x32xf32> -> vector<16x32xf32>
    %194 = arith.addf %185, %193 : vector<16x32xf32>
    %c16_188 = arith.constant 16 : index
    %c0_189 = arith.constant 0 : index
    %195 = vector.load %arg18[%c16_188, %c0_189] : memref<48x32xf32, #tpu.memory_space<vmem>>, vector<16x32xf32>
    %c2_190 = arith.constant 2 : index
    %c2_191 = arith.constant 2 : index
    %c0_192 = arith.constant 0 : index
    %c0_193 = arith.constant 0 : index
    %196 = vector.load %arg5[%c2_190, %c2_191, %c0_192, %c0_193] : memref<4x5x32x32xf32, #tpu.memory_space<vmem>>, vector<1x1x32x32xf32>
    %197 = vector.shape_cast %196 : vector<1x1x32x32xf32> to vector<32x32xf32>
    %cst_194 = arith.constant dense<0.000000e+00> : vector<16x32xf32>
    %198 = tpu.matmul %195, %197, %cst_194 {dimension_numbers = #tpu.dot_dimension_numbers<[1], [0], [0], [1], [0, 0, 1, 1], [], []>} : vector<16x32xf32>, vector<32x32xf32>, vector<16x32xf32> -> vector<16x32xf32>
    %199 = arith.addf %190, %198 : vector<16x32xf32>
    %c2_195 = arith.constant 2 : index
    %c2_196 = arith.constant 2 : index
    %c0_197 = arith.constant 0 : index
    %c0_198 = arith.constant 0 : index
    %200 = vector.load %arg6[%c2_195, %c2_196, %c0_197, %c0_198] : memref<4x5x32x32xf32, #tpu.memory_space<vmem>>, vector<1x1x32x32xf32>
    %201 = vector.shape_cast %200 : vector<1x1x32x32xf32> to vector<32x32xf32>
    %cst_199 = arith.constant dense<0.000000e+00> : vector<16x32xf32>
    %202 = tpu.matmul %195, %201, %cst_199 {dimension_numbers = #tpu.dot_dimension_numbers<[1], [0], [0], [1], [0, 0, 1, 1], [], []>} : vector<16x32xf32>, vector<32x32xf32>, vector<16x32xf32> -> vector<16x32xf32>
    %203 = arith.addf %194, %202 : vector<16x32xf32>
    %c20_200 = arith.constant 20 : index
    %c0_201 = arith.constant 0 : index
    %204 = vector.load %arg18[%c20_200, %c0_201] : memref<48x32xf32, #tpu.memory_space<vmem>>, vector<16x32xf32>
    %c2_202 = arith.constant 2 : index
    %c3_203 = arith.constant 3 : index
    %c0_204 = arith.constant 0 : index
    %c0_205 = arith.constant 0 : index
    %205 = vector.load %arg5[%c2_202, %c3_203, %c0_204, %c0_205] : memref<4x5x32x32xf32, #tpu.memory_space<vmem>>, vector<1x1x32x32xf32>
    %206 = vector.shape_cast %205 : vector<1x1x32x32xf32> to vector<32x32xf32>
    %cst_206 = arith.constant dense<0.000000e+00> : vector<16x32xf32>
    %207 = tpu.matmul %204, %206, %cst_206 {dimension_numbers = #tpu.dot_dimension_numbers<[1], [0], [0], [1], [0, 0, 1, 1], [], []>} : vector<16x32xf32>, vector<32x32xf32>, vector<16x32xf32> -> vector<16x32xf32>
    %208 = arith.addf %199, %207 : vector<16x32xf32>
    %c2_207 = arith.constant 2 : index
    %c3_208 = arith.constant 3 : index
    %c0_209 = arith.constant 0 : index
    %c0_210 = arith.constant 0 : index
    %209 = vector.load %arg6[%c2_207, %c3_208, %c0_209, %c0_210] : memref<4x5x32x32xf32, #tpu.memory_space<vmem>>, vector<1x1x32x32xf32>
    %210 = vector.shape_cast %209 : vector<1x1x32x32xf32> to vector<32x32xf32>
    %cst_211 = arith.constant dense<0.000000e+00> : vector<16x32xf32>
    %211 = tpu.matmul %204, %210, %cst_211 {dimension_numbers = #tpu.dot_dimension_numbers<[1], [0], [0], [1], [0, 0, 1, 1], [], []>} : vector<16x32xf32>, vector<32x32xf32>, vector<16x32xf32> -> vector<16x32xf32>
    %212 = arith.addf %203, %211 : vector<16x32xf32>
    %c24 = arith.constant 24 : index
    %c0_212 = arith.constant 0 : index
    %213 = vector.load %arg18[%c24, %c0_212] : memref<48x32xf32, #tpu.memory_space<vmem>>, vector<16x32xf32>
    %c2_213 = arith.constant 2 : index
    %c4_214 = arith.constant 4 : index
    %c0_215 = arith.constant 0 : index
    %c0_216 = arith.constant 0 : index
    %214 = vector.load %arg5[%c2_213, %c4_214, %c0_215, %c0_216] : memref<4x5x32x32xf32, #tpu.memory_space<vmem>>, vector<1x1x32x32xf32>
    %215 = vector.shape_cast %214 : vector<1x1x32x32xf32> to vector<32x32xf32>
    %cst_217 = arith.constant dense<0.000000e+00> : vector<16x32xf32>
    %216 = tpu.matmul %213, %215, %cst_217 {dimension_numbers = #tpu.dot_dimension_numbers<[1], [0], [0], [1], [0, 0, 1, 1], [], []>} : vector<16x32xf32>, vector<32x32xf32>, vector<16x32xf32> -> vector<16x32xf32>
    %217 = arith.addf %208, %216 : vector<16x32xf32>
    %c2_218 = arith.constant 2 : index
    %c4_219 = arith.constant 4 : index
    %c0_220 = arith.constant 0 : index
    %c0_221 = arith.constant 0 : index
    %218 = vector.load %arg6[%c2_218, %c4_219, %c0_220, %c0_221] : memref<4x5x32x32xf32, #tpu.memory_space<vmem>>, vector<1x1x32x32xf32>
    %219 = vector.shape_cast %218 : vector<1x1x32x32xf32> to vector<32x32xf32>
    %cst_222 = arith.constant dense<0.000000e+00> : vector<16x32xf32>
    %220 = tpu.matmul %213, %219, %cst_222 {dimension_numbers = #tpu.dot_dimension_numbers<[1], [0], [0], [1], [0, 0, 1, 1], [], []>} : vector<16x32xf32>, vector<32x32xf32>, vector<16x32xf32> -> vector<16x32xf32>
    %221 = arith.addf %212, %220 : vector<16x32xf32>
    %c2_223 = arith.constant 2 : index
    %c0_224 = arith.constant 0 : index
    %222 = vector.load %arg7[%c2_223, %c0_224] : memref<4x32xf32, #tpu.memory_space<vmem>>, vector<1x32xf32>
    %223 = vector.broadcast %222 : vector<1x32xf32> to vector<16x32xf32>
    %224 = arith.addf %217, %223 : vector<16x32xf32>
    %225 = math.tanh %224 : vector<16x32xf32>
    %c2_225 = arith.constant 2 : index
    %c0_226 = arith.constant 0 : index
    %226 = vector.load %arg8[%c2_225, %c0_226] : memref<4x32xf32, #tpu.memory_space<vmem>>, vector<1x32xf32>
    %227 = vector.broadcast %226 : vector<1x32xf32> to vector<16x32xf32>
    %228 = arith.addf %221, %227 : vector<16x32xf32>
    %229 = arith.negf %228 : vector<16x32xf32>
    %230 = math.exp %229 : vector<16x32xf32>
    %cst_227 = arith.constant 1.000000e+00 : f32
    %231 = vector.broadcast %cst_227 : f32 to vector<16x32xf32>
    %232 = arith.addf %231, %230 : vector<16x32xf32>
    %233 = arith.divf %231, %232 : vector<16x32xf32>
    %234 = arith.mulf %225, %233 : vector<16x32xf32>
    %c2_228 = arith.constant 2 : index
    %c0_229 = arith.constant 0 : index
    %c0_230 = arith.constant 0 : index
    %235 = vector.load %arg11[%c2_228, %c0_229, %c0_230] : memref<4x32x32xf32, #tpu.memory_space<vmem>>, vector<1x32x32xf32>
    %236 = vector.shape_cast %235 : vector<1x32x32xf32> to vector<32x32xf32>
    %cst_231 = arith.constant dense<0.000000e+00> : vector<16x32xf32>
    %237 = tpu.matmul %234, %236, %cst_231 {dimension_numbers = #tpu.dot_dimension_numbers<[1], [0], [0], [1], [0, 0, 1, 1], [], []>} : vector<16x32xf32>, vector<32x32xf32>, vector<16x32xf32> -> vector<16x32xf32>
    %c2_232 = arith.constant 2 : index
    %c0_233 = arith.constant 0 : index
    %238 = vector.load %arg12[%c2_232, %c0_233] : memref<4x32xf32, #tpu.memory_space<vmem>>, vector<1x32xf32>
    %239 = vector.broadcast %238 : vector<1x32xf32> to vector<16x32xf32>
    %240 = arith.addf %237, %239 : vector<16x32xf32>
    %241 = arith.addf %165, %240 : vector<16x32xf32>
    %c2_234 = arith.constant 2 : index
    %c0_235 = arith.constant 0 : index
    %c0_236 = arith.constant 0 : index
    %242 = vector.load %arg9[%c2_234, %c0_235, %c0_236] : memref<3x32x32xf32, #tpu.memory_space<vmem>>, vector<1x32x32xf32>
    %243 = vector.shape_cast %242 : vector<1x32x32xf32> to vector<32x32xf32>
    %cst_237 = arith.constant dense<0.000000e+00> : vector<16x32xf32>
    %244 = tpu.matmul %234, %243, %cst_237 {dimension_numbers = #tpu.dot_dimension_numbers<[1], [0], [0], [1], [0, 0, 1, 1], [], []>} : vector<16x32xf32>, vector<32x32xf32>, vector<16x32xf32> -> vector<16x32xf32>
    %c2_238 = arith.constant 2 : index
    %c0_239 = arith.constant 0 : index
    %245 = vector.load %arg10[%c2_238, %c0_239] : memref<3x32xf32, #tpu.memory_space<vmem>>, vector<1x32xf32>
    %246 = vector.broadcast %245 : vector<1x32xf32> to vector<16x32xf32>
    %247 = arith.addf %244, %246 : vector<16x32xf32>
    %248 = arith.addf %173, %247 : vector<16x32xf32>
    %249 = arith.mulf %248, %8 : vector<16x32xf32>
    %c16_240 = arith.constant 16 : index
    %c0_241 = arith.constant 0 : index
    %250 = vector.load %arg18[%c16_240, %c0_241] : memref<48x32xf32, #tpu.memory_space<vmem>>, vector<16x32xf32>
    tpu.vector_store %arg18[%c16_240, %c0_241], %249 {strides = array<i32>} : memref<48x32xf32, #tpu.memory_space<vmem>>, vector<16x32xf32>,
    %cst_242 = arith.constant 0.000000e+00 : f32
    %251 = vector.broadcast %cst_242 : f32 to vector<16x32xf32>
    %cst_243 = arith.constant 0.000000e+00 : f32
    %252 = vector.broadcast %cst_243 : f32 to vector<16x32xf32>
    %c8_244 = arith.constant 8 : index
    %c0_245 = arith.constant 0 : index
    %253 = vector.load %arg18[%c8_244, %c0_245] : memref<48x32xf32, #tpu.memory_space<vmem>>, vector<16x32xf32>
    %c3_246 = arith.constant 3 : index
    %c1_247 = arith.constant 1 : index
    %c0_248 = arith.constant 0 : index
    %c0_249 = arith.constant 0 : index
    %254 = vector.load %arg5[%c3_246, %c1_247, %c0_248, %c0_249] : memref<4x5x32x32xf32, #tpu.memory_space<vmem>>, vector<1x1x32x32xf32>
    %255 = vector.shape_cast %254 : vector<1x1x32x32xf32> to vector<32x32xf32>
    %cst_250 = arith.constant dense<0.000000e+00> : vector<16x32xf32>
    %256 = tpu.matmul %253, %255, %cst_250 {dimension_numbers = #tpu.dot_dimension_numbers<[1], [0], [0], [1], [0, 0, 1, 1], [], []>} : vector<16x32xf32>, vector<32x32xf32>, vector<16x32xf32> -> vector<16x32xf32>
    %257 = arith.addf %251, %256 : vector<16x32xf32>
    %c3_251 = arith.constant 3 : index
    %c1_252 = arith.constant 1 : index
    %c0_253 = arith.constant 0 : index
    %c0_254 = arith.constant 0 : index
    %258 = vector.load %arg6[%c3_251, %c1_252, %c0_253, %c0_254] : memref<4x5x32x32xf32, #tpu.memory_space<vmem>>, vector<1x1x32x32xf32>
    %259 = vector.shape_cast %258 : vector<1x1x32x32xf32> to vector<32x32xf32>
    %cst_255 = arith.constant dense<0.000000e+00> : vector<16x32xf32>
    %260 = tpu.matmul %253, %259, %cst_255 {dimension_numbers = #tpu.dot_dimension_numbers<[1], [0], [0], [1], [0, 0, 1, 1], [], []>} : vector<16x32xf32>, vector<32x32xf32>, vector<16x32xf32> -> vector<16x32xf32>
    %261 = arith.addf %252, %260 : vector<16x32xf32>
    %c16_256 = arith.constant 16 : index
    %c0_257 = arith.constant 0 : index
    %262 = vector.load %arg18[%c16_256, %c0_257] : memref<48x32xf32, #tpu.memory_space<vmem>>, vector<16x32xf32>
    %c3_258 = arith.constant 3 : index
    %c2_259 = arith.constant 2 : index
    %c0_260 = arith.constant 0 : index
    %c0_261 = arith.constant 0 : index
    %263 = vector.load %arg5[%c3_258, %c2_259, %c0_260, %c0_261] : memref<4x5x32x32xf32, #tpu.memory_space<vmem>>, vector<1x1x32x32xf32>
    %264 = vector.shape_cast %263 : vector<1x1x32x32xf32> to vector<32x32xf32>
    %cst_262 = arith.constant dense<0.000000e+00> : vector<16x32xf32>
    %265 = tpu.matmul %262, %264, %cst_262 {dimension_numbers = #tpu.dot_dimension_numbers<[1], [0], [0], [1], [0, 0, 1, 1], [], []>} : vector<16x32xf32>, vector<32x32xf32>, vector<16x32xf32> -> vector<16x32xf32>
    %266 = arith.addf %257, %265 : vector<16x32xf32>
    %c3_263 = arith.constant 3 : index
    %c2_264 = arith.constant 2 : index
    %c0_265 = arith.constant 0 : index
    %c0_266 = arith.constant 0 : index
    %267 = vector.load %arg6[%c3_263, %c2_264, %c0_265, %c0_266] : memref<4x5x32x32xf32, #tpu.memory_space<vmem>>, vector<1x1x32x32xf32>
    %268 = vector.shape_cast %267 : vector<1x1x32x32xf32> to vector<32x32xf32>
    %cst_267 = arith.constant dense<0.000000e+00> : vector<16x32xf32>
    %269 = tpu.matmul %262, %268, %cst_267 {dimension_numbers = #tpu.dot_dimension_numbers<[1], [0], [0], [1], [0, 0, 1, 1], [], []>} : vector<16x32xf32>, vector<32x32xf32>, vector<16x32xf32> -> vector<16x32xf32>
    %270 = arith.addf %261, %269 : vector<16x32xf32>
    %c24_268 = arith.constant 24 : index
    %c0_269 = arith.constant 0 : index
    %271 = vector.load %arg18[%c24_268, %c0_269] : memref<48x32xf32, #tpu.memory_space<vmem>>, vector<16x32xf32>
    %c3_270 = arith.constant 3 : index
    %c3_271 = arith.constant 3 : index
    %c0_272 = arith.constant 0 : index
    %c0_273 = arith.constant 0 : index
    %272 = vector.load %arg5[%c3_270, %c3_271, %c0_272, %c0_273] : memref<4x5x32x32xf32, #tpu.memory_space<vmem>>, vector<1x1x32x32xf32>
    %273 = vector.shape_cast %272 : vector<1x1x32x32xf32> to vector<32x32xf32>
    %cst_274 = arith.constant dense<0.000000e+00> : vector<16x32xf32>
    %274 = tpu.matmul %271, %273, %cst_274 {dimension_numbers = #tpu.dot_dimension_numbers<[1], [0], [0], [1], [0, 0, 1, 1], [], []>} : vector<16x32xf32>, vector<32x32xf32>, vector<16x32xf32> -> vector<16x32xf32>
    %275 = arith.addf %266, %274 : vector<16x32xf32>
    %c3_275 = arith.constant 3 : index
    %c3_276 = arith.constant 3 : index
    %c0_277 = arith.constant 0 : index
    %c0_278 = arith.constant 0 : index
    %276 = vector.load %arg6[%c3_275, %c3_276, %c0_277, %c0_278] : memref<4x5x32x32xf32, #tpu.memory_space<vmem>>, vector<1x1x32x32xf32>
    %277 = vector.shape_cast %276 : vector<1x1x32x32xf32> to vector<32x32xf32>
    %cst_279 = arith.constant dense<0.000000e+00> : vector<16x32xf32>
    %278 = tpu.matmul %271, %277, %cst_279 {dimension_numbers = #tpu.dot_dimension_numbers<[1], [0], [0], [1], [0, 0, 1, 1], [], []>} : vector<16x32xf32>, vector<32x32xf32>, vector<16x32xf32> -> vector<16x32xf32>
    %279 = arith.addf %270, %278 : vector<16x32xf32>
    %c3_280 = arith.constant 3 : index
    %c0_281 = arith.constant 0 : index
    %280 = vector.load %arg7[%c3_280, %c0_281] : memref<4x32xf32, #tpu.memory_space<vmem>>, vector<1x32xf32>
    %281 = vector.broadcast %280 : vector<1x32xf32> to vector<16x32xf32>
    %282 = arith.addf %275, %281 : vector<16x32xf32>
    %283 = math.tanh %282 : vector<16x32xf32>
    %c3_282 = arith.constant 3 : index
    %c0_283 = arith.constant 0 : index
    %284 = vector.load %arg8[%c3_282, %c0_283] : memref<4x32xf32, #tpu.memory_space<vmem>>, vector<1x32xf32>
    %285 = vector.broadcast %284 : vector<1x32xf32> to vector<16x32xf32>
    %286 = arith.addf %279, %285 : vector<16x32xf32>
    %287 = arith.negf %286 : vector<16x32xf32>
    %288 = math.exp %287 : vector<16x32xf32>
    %cst_284 = arith.constant 1.000000e+00 : f32
    %289 = vector.broadcast %cst_284 : f32 to vector<16x32xf32>
    %290 = arith.addf %289, %288 : vector<16x32xf32>
    %291 = arith.divf %289, %290 : vector<16x32xf32>
    %292 = arith.mulf %283, %291 : vector<16x32xf32>
    %c3_285 = arith.constant 3 : index
    %c0_286 = arith.constant 0 : index
    %c0_287 = arith.constant 0 : index
    %293 = vector.load %arg11[%c3_285, %c0_286, %c0_287] : memref<4x32x32xf32, #tpu.memory_space<vmem>>, vector<1x32x32xf32>
    %294 = vector.shape_cast %293 : vector<1x32x32xf32> to vector<32x32xf32>
    %cst_288 = arith.constant dense<0.000000e+00> : vector<16x32xf32>
    %295 = tpu.matmul %292, %294, %cst_288 {dimension_numbers = #tpu.dot_dimension_numbers<[1], [0], [0], [1], [0, 0, 1, 1], [], []>} : vector<16x32xf32>, vector<32x32xf32>, vector<16x32xf32> -> vector<16x32xf32>
    %c3_289 = arith.constant 3 : index
    %c0_290 = arith.constant 0 : index
    %296 = vector.load %arg12[%c3_289, %c0_290] : memref<4x32xf32, #tpu.memory_space<vmem>>, vector<1x32xf32>
    %297 = vector.broadcast %296 : vector<1x32xf32> to vector<16x32xf32>
    %298 = arith.addf %295, %297 : vector<16x32xf32>
    %299 = arith.addf %241, %298 : vector<16x32xf32>
    %300 = arith.mulf %299, %8 : vector<16x32xf32>
    %c0_291 = arith.constant 0 : index
    %c0_292 = arith.constant 0 : index
    %301 = vector.load %arg13[%c0_291, %c0_292] : memref<32x4xf32, #tpu.memory_space<vmem>>, vector<32x4xf32>
    %cst_293 = arith.constant dense<0.000000e+00> : vector<16x4xf32>
    %302 = tpu.matmul %300, %301, %cst_293 {dimension_numbers = #tpu.dot_dimension_numbers<[1], [0], [0], [1], [0, 0, 1, 1], [], []>} : vector<16x32xf32>, vector<32x4xf32>, vector<16x4xf32> -> vector<16x4xf32>
    %c0_294 = arith.constant 0 : index
    %c0_295 = arith.constant 0 : index
    %303 = vector.load %arg14[%c0_294, %c0_295] : memref<1x4xf32, #tpu.memory_space<vmem>>, vector<1x4xf32>
    %304 = vector.broadcast %303 : vector<1x4xf32> to vector<16x4xf32>
    %305 = arith.addf %302, %304 : vector<16x4xf32>
    %306 = arith.mulf %305, %10 : vector<16x4xf32>
    %cst_296 = arith.constant dense<0.000000e+00> : vector<16xf32>
    %307 = vector.multi_reduction <add>, %306, %cst_296 [1] : vector<16x4xf32> to vector<16xf32>
    %308 = vector.shape_cast %307 : vector<16xf32> to vector<16x1xf32>
    %cst_297 = arith.constant 4.000000e+00 : f32
    %309 = vector.broadcast %cst_297 : f32 to vector<16x1xf32>
    %310 = arith.divf %308, %309 : vector<16x1xf32>
    %311 = vector.broadcast %310 : vector<16x1xf32> to vector<16x4xf32>
    %312 = arith.subf %306, %311 : vector<16x4xf32>
    %313 = arith.mulf %312, %312 : vector<16x4xf32>
    %cst_298 = arith.constant dense<0.000000e+00> : vector<16xf32>
    %314 = vector.multi_reduction <add>, %313, %cst_298 [1] : vector<16x4xf32> to vector<16xf32>
    %315 = vector.shape_cast %314 : vector<16xf32> to vector<16x1xf32>
    %cst_299 = arith.constant 4.000000e+00 : f32
    %316 = vector.broadcast %cst_299 : f32 to vector<16x1xf32>
    %317 = arith.divf %315, %316 : vector<16x1xf32>
    %318 = vector.broadcast %310 : vector<16x1xf32> to vector<16x4xf32>
    %319 = arith.subf %306, %318 : vector<16x4xf32>
    %cst_300 = arith.constant 9.99999974E-6 : f32
    %320 = vector.broadcast %cst_300 : f32 to vector<16x1xf32>
    %321 = arith.addf %317, %320 : vector<16x1xf32>
    %322 = math.rsqrt %321 : vector<16x1xf32>
    %323 = vector.broadcast %322 : vector<16x1xf32> to vector<16x4xf32>
    %324 = arith.mulf %319, %323 : vector<16x4xf32>
    %c0_301 = arith.constant 0 : index
    %c0_302 = arith.constant 0 : index
    %325 = vector.load %arg15[%c0_301, %c0_302] : memref<1x4xf32, #tpu.memory_space<vmem>>, vector<1x4xf32>
    %326 = vector.broadcast %325 : vector<1x4xf32> to vector<16x4xf32>
    %327 = arith.mulf %324, %326 : vector<16x4xf32>
    %c0_303 = arith.constant 0 : index
    %c0_304 = arith.constant 0 : index
    %328 = vector.load %arg16[%c0_303, %c0_304] : memref<1x4xf32, #tpu.memory_space<vmem>>, vector<1x4xf32>
    %329 = vector.broadcast %328 : vector<1x4xf32> to vector<16x4xf32>
    %330 = arith.addf %327, %329 : vector<16x4xf32>
    %c0_305 = arith.constant 0 : index
    %c0_306 = arith.constant 0 : index
    %331 = vector.load %arg17[%c0_305, %c0_306] : memref<16x4xf32, #tpu.memory_space<vmem>>, vector<16x4xf32>
    tpu.vector_store %arg17[%c0_305, %c0_306], %330 {strides = array<i32>} : memref<16x4xf32, #tpu.memory_space<vmem>>, vector<16x4xf32>,
    return
  }
  func.func @transform_0(%arg0: i32, %arg1: memref<2xi32, #tpu.memory_space<smem>>) -> (i32, i32) {
    %c0_i32 = arith.constant 0 : i32
    %c0_i32_0 = arith.constant 0 : i32
    return %arg0, %c0_i32 : i32, i32
  }
  func.func @transform_1(%arg0: i32, %arg1: memref<2xi32, #tpu.memory_space<smem>>) -> (i32, i32) {
    %c0_i32 = arith.constant 0 : i32
    %c0_i32_0 = arith.constant 0 : i32
    %c0_i32_1 = arith.constant 0 : i32
    return %c0_i32, %c0_i32_0 : i32, i32
  }
  func.func @transform_2(%arg0: i32, %arg1: memref<2xi32, #tpu.memory_space<smem>>) -> (i32, i32) {
    %c0_i32 = arith.constant 0 : i32
    %c0_i32_0 = arith.constant 0 : i32
    %c0_i32_1 = arith.constant 0 : i32
    return %c0_i32, %c0_i32_0 : i32, i32
  }
  func.func @transform_3(%arg0: i32, %arg1: memref<2xi32, #tpu.memory_space<smem>>) -> (i32, i32, i32, i32) {
    %c0_i32 = arith.constant 0 : i32
    %c0_i32_0 = arith.constant 0 : i32
    %c0_i32_1 = arith.constant 0 : i32
    %c0_i32_2 = arith.constant 0 : i32
    %c0_i32_3 = arith.constant 0 : i32
    return %c0_i32, %c0_i32_0, %c0_i32_1, %c0_i32_2 : i32, i32, i32, i32
  }
  func.func @transform_4(%arg0: i32, %arg1: memref<2xi32, #tpu.memory_space<smem>>) -> (i32, i32, i32, i32) {
    %c0_i32 = arith.constant 0 : i32
    %c0_i32_0 = arith.constant 0 : i32
    %c0_i32_1 = arith.constant 0 : i32
    %c0_i32_2 = arith.constant 0 : i32
    %c0_i32_3 = arith.constant 0 : i32
    return %c0_i32, %c0_i32_0, %c0_i32_1, %c0_i32_2 : i32, i32, i32, i32
  }
  func.func @transform_5(%arg0: i32, %arg1: memref<2xi32, #tpu.memory_space<smem>>) -> (i32, i32) {
    %c0_i32 = arith.constant 0 : i32
    %c0_i32_0 = arith.constant 0 : i32
    %c0_i32_1 = arith.constant 0 : i32
    return %c0_i32, %c0_i32_0 : i32, i32
  }
  func.func @transform_6(%arg0: i32, %arg1: memref<2xi32, #tpu.memory_space<smem>>) -> (i32, i32) {
    %c0_i32 = arith.constant 0 : i32
    %c0_i32_0 = arith.constant 0 : i32
    %c0_i32_1 = arith.constant 0 : i32
    return %c0_i32, %c0_i32_0 : i32, i32
  }
  func.func @transform_7(%arg0: i32, %arg1: memref<2xi32, #tpu.memory_space<smem>>) -> (i32, i32, i32) {
    %c0_i32 = arith.constant 0 : i32
    %c0_i32_0 = arith.constant 0 : i32
    %c0_i32_1 = arith.constant 0 : i32
    %c0_i32_2 = arith.constant 0 : i32
    return %c0_i32, %c0_i32_0, %c0_i32_1 : i32, i32, i32
  }
  func.func @transform_8(%arg0: i32, %arg1: memref<2xi32, #tpu.memory_space<smem>>) -> (i32, i32) {
    %c0_i32 = arith.constant 0 : i32
    %c0_i32_0 = arith.constant 0 : i32
    %c0_i32_1 = arith.constant 0 : i32
    return %c0_i32, %c0_i32_0 : i32, i32
  }
  func.func @transform_9(%arg0: i32, %arg1: memref<2xi32, #tpu.memory_space<smem>>) -> (i32, i32, i32) {
    %c0_i32 = arith.constant 0 : i32
    %c0_i32_0 = arith.constant 0 : i32
    %c0_i32_1 = arith.constant 0 : i32
    %c0_i32_2 = arith.constant 0 : i32
    return %c0_i32, %c0_i32_0, %c0_i32_1 : i32, i32, i32
  }
  func.func @transform_10(%arg0: i32, %arg1: memref<2xi32, #tpu.memory_space<smem>>) -> (i32, i32) {
    %c0_i32 = arith.constant 0 : i32
    %c0_i32_0 = arith.constant 0 : i32
    %c0_i32_1 = arith.constant 0 : i32
    return %c0_i32, %c0_i32_0 : i32, i32
  }
  func.func @transform_11(%arg0: i32, %arg1: memref<2xi32, #tpu.memory_space<smem>>) -> (i32, i32) {
    %c0_i32 = arith.constant 0 : i32
    %c0_i32_0 = arith.constant 0 : i32
    %c0_i32_1 = arith.constant 0 : i32
    return %c0_i32, %c0_i32_0 : i32, i32
  }
  func.func @transform_12(%arg0: i32, %arg1: memref<2xi32, #tpu.memory_space<smem>>) -> (i32, i32) {
    %c0_i32 = arith.constant 0 : i32
    %c0_i32_0 = arith.constant 0 : i32
    %c0_i32_1 = arith.constant 0 : i32
    return %c0_i32, %c0_i32_0 : i32, i32
  }
  func.func @transform_13(%arg0: i32, %arg1: memref<2xi32, #tpu.memory_space<smem>>) -> (i32, i32) {
    %c0_i32 = arith.constant 0 : i32
    %c0_i32_0 = arith.constant 0 : i32
    %c0_i32_1 = arith.constant 0 : i32
    return %c0_i32, %c0_i32_0 : i32, i32
  }
  func.func @transform_14(%arg0: i32, %arg1: memref<2xi32, #tpu.memory_space<smem>>) -> (i32, i32) {
    %c0_i32 = arith.constant 0 : i32
    %c0_i32_0 = arith.constant 0 : i32
    %c0_i32_1 = arith.constant 0 : i32
    return %c0_i32, %c0_i32_0 : i32, i32
  }
  func.func @transform_15(%arg0: i32, %arg1: memref<2xi32, #tpu.memory_space<smem>>) -> (i32, i32) {
    %c0_i32 = arith.constant 0 : i32
    %c0_i32_0 = arith.constant 0 : i32
    return %arg0, %c0_i32 : i32, i32
  }
}

</mosaic_0001>

<bundles_post_ra>
// kernel: tpu_custom_call.1
= control target key start
LH: loop header
LB: loop body
LE: loop exit
PB: predicated region body
PF: predicated region fallthrough
CT: control target
= control target key end

     0   :  { %s6993_s0 = inlined_call_operand.vmem [shape: s32[2], index: 0, kind: input, shape index: {}]   ;;  %s6994_s1 = inlined_call_operand.vmem [shape: f32[32,4], index: 1, kind: input, shape index: {}]   ;;  %s6995_s2 = inlined_call_operand.vmem [shape: f32[4,32], index: 2, kind: input, shape index: {}]   ;;  %s6996_s3 = inlined_call_operand.hbm [shape: f32[1,32], index: 3, kind: input, shape index: {}]   ;;  %s6997_s4 = inlined_call_operand.hbm [shape: f32[4,5,32,32], index: 4, kind: input, shape index: {}]   ;;  %s6998_s5 = inlined_call_operand.hbm [shape: f32[4,5,32,32], index: 5, kind: input, shape index: {}]   ;;  %s6999_s6 = inlined_call_operand.hbm [shape: f32[4,32], index: 6, kind: input, shape index: {}]   ;;  %s7000_s7 = inlined_call_operand.hbm [shape: f32[4,32], index: 7, kind: input, shape index: {}]   ;;  %s7001_s8 = inlined_call_operand.vmem [shape: f32[3,32,32], index: 8, kind: input, shape index: {}]   ;;  %s7002_s9 = inlined_call_operand.vmem [shape: f32[3,32], index: 9, kind: input, shape index: {}]   ;;  %s7003_s10 = inlined_call_operand.hbm [shape: f32[4,32,32], index: 10, kind: input, shape index: {}]   ;;  %s7004_s11 = inlined_call_operand.vmem [shape: f32[4,32], index: 11, kind: input, shape index: {}]   ;;  %s7005_s12 = inlined_call_operand.vmem [shape: f32[32,4], index: 12, kind: input, shape index: {}]   ;;  %s7006_s13 = inlined_call_operand.vmem [shape: f32[1,4], index: 13, kind: input, shape index: {}]   ;;  %s7007_s14 = inlined_call_operand.vmem [shape: f32[1,4], index: 14, kind: input, shape index: {}]   ;;  %s7008_s15 = inlined_call_operand.vmem [shape: f32[1,4], index: 15, kind: input, shape index: {}]   ;;  %s7009_s16 = inlined_call_operand.vmem [shape: f32[32,4], index: 16, kind: output, shape index: {}]  }
   0x1   :  { %7014 = sst [smem:[#allocation21_spill]] %s6993_s0 }
   0x2   :  { %7015 = sst [smem:[#allocation22_spill]] %s7002_s9  ;;  %s7019_s23 = sld [smem:[#allocation21_spill]] }
   0x3   :  { %7016 = sst [smem:[#allocation23_spill]] %s7007_s14 }
   0x4   :  { %7017 = sst [smem:[#allocation24_spill]] %s7008_s15 }
   0x5   :  { %7018 = sst [smem:[#allocation25_spill]] %s7009_s16 }
   0x8   :  { %s21_s9 = sshll.u32 %s7019_s23, 4  ;;  %s22_s9 = int_to_ptr.vmem [resolvable:$true] %s21_s9 }
   0x9   :  { %s6237_s24 = scalar_lea.vmem %s22_s9, 16  ;;  %p6242_p1 = scmp.lt.s32.totalorder %s22_s9, %s22_s9 }
   0xa   :  { %p6238_p0 = scmp.ne.s32.totalorder %s22_s9, %s6237_s24  ;;  %p6243_p2 = scmp.lt.s32.totalorder %s6237_s24, %s6237_s24 }
   0xc   :  { %p6244_p3 = por %p6243_p2, %p6242_p1 }
   0xe   :  { %p6245_p4 = pnand %p6244_p3, %p6238_p0 }
  0x10   :  { %6248 = shalt.err (!%p6245_p4)  }
  0x11   :  { %s6443_s25 = smov [#allocation4]  }
  0x12   :  { %24 = dma.vmem_to_smem %s22_s9, 16, %s6443_s25, [#allocation3] }
  0x13   :  { %6421 = dma.done.wait [#allocation3], 16 }
  0x14   :  { %6422 = vsyncadd [#allocation3], 4294967280 }
  0x15   :  { %26 = sfence }
  0x16   :  { %27 = vsyncpa [#allocation6], 0 }
  0x17   :  { %28 = vsyncpa [#allocation8], 0 }
  0x18   :  { %29 = vsyncpa [#allocation11], 0 }
  0x19   :  { %30 = vsyncpa [#allocation14], 0  ;;  %s6541_s26 = smov 0  }
  0x1a LB: > { %7020 = sst [smem:[#allocation20_spill]] %s6441_s26  ;;  %s6444_s27 = smov [#allocation7]   ;;  %s6441_s26 = sphi %s6541_s26, %s36_s26  }
  0x1b   : > { %s413_s28 = sshll.u32 %s6444_s27, 4  ;;  %s6547_s9 = sadd.s32 4294967295, %s6441_s26   ;;  %s6552_s28 = int_to_ptr.vmem [resolvable:$true] %s413_s28 }
  0x1c   : > { %p4785_p5 = scmp.ge.s32.totalorder %s6441_s26, 1  ;;  %p387_p6 = scmp.lt.s32.totalorder %s6441_s26, 3 }
  0x1d   : > { %p7012_p7 = scmp.eq.s32.totalorder %s6547_s9, 0  ;;  %s6445_s30 = smov [#allocation10]  }
  0x1e   : > { %p6554_p8 = pnand %p4785_p5, %p387_p6  ;;  %s440_s0 = sshll.u32 %s6445_s30, 4  ;;  %s6560_s0 = int_to_ptr.vmem [resolvable:$true] %s440_s0 }
  0x1f   : > { %s6446_s18 = smov [#allocation5]   ;;  %s6447_s20 = smov [#allocation9]  }
  0x20   : > { %s7021_s29 = scalar_select %p6554_p8, 1, 0 }
  0x21   : > { %p6136_p9 = pneg %p6554_p8  ;;  %s403_s19 = sshll.u32 %s6446_s18, 4  ;;  %s6568_s19 = int_to_ptr.vmem [resolvable:$true] %s403_s19 }
  0x22   : > { %s6570_s21 = sshll.u32 %s6447_s20, 4  ;;  %s6249_s24 = scalar_lea.hbm %s6997_s4, 10240  ;;  %s427_s21 = int_to_ptr.vmem [resolvable:$true] %s6570_s21 }
  0x23   : > { %p6564_p10 = pnand %p7012_p7, %p6136_p9  ;;  %p6250_p11 = scmp.ne.s32.totalorder %s6997_s4, %s6249_s24 }
  0x24   : > { %p6256_p1 = scmp.lt.u32.totalorder %s6249_s24, %s6997_s4 }
  0x25   : > { %p6580_p12 = pneg %p6564_p10 }
  0x27   : > { %p6252_p13 = pnand %p6580_p12, %p6250_p11 }
  0x29   : > { %p6253_p0 = pneg %p6252_p13 }
  0x2b   : > { %p6258_p2 = pnand %p6256_p1, %p6253_p0 }
  0x2d   : > { %6261 = shalt.err (!%p6258_p2)
}
  0x2e   : > { %s6262_s22 = scalar_lea.vmem %s6552_s28, 10240  ;;  %p6270_p6 = scmp.lt.s32.totalorder %s6552_s28, %s6552_s28 }
  0x2f   : > { %p6263_p3 = scmp.ne.s32.totalorder %s6552_s28, %s6262_s22  ;;  %p6271_p9 = scmp.lt.s32.totalorder %s6262_s22, %s6262_s22 }
  0x31   : > { %p6265_p4 = pnand %p6263_p3, %p6580_p12  ;;  %p6272_p11 = por %p6271_p9, %p6270_p6 }
  0x33   : > { %p6266_p5 = pneg %p6265_p4 }
  0x35   : > { %p6273_p13 = pnand %p6272_p11, %p6266_p5 }
  0x37   : > { %6276 = shalt.err (!%p6273_p13)
}
  0x38   : > { %s6448_s23 = smov 128   ;;  %s6449_s24 = smov 8  }
  0x39   : > { %6142 = dma.hbm_to_vmem [thread:$0]  (!%p6564_p10), %s6997_s4, 10240, %s6552_s28, [#allocation8], %s6448_s23, %s6448_s23, %s6449_s24  }
  0x3a   : > { %s6277_s22 = scalar_lea.hbm %s6999_s6, 64 }
  0x3b   : > { %p6278_p0 = scmp.ne.s32.totalorder %s6999_s6, %s6277_s22  ;;  %p6284_p3 = scmp.lt.u32.totalorder %s6277_s22, %s6999_s6 }
  0x3d   : > { %p6280_p1 = pnand %p6278_p0, %p6580_p12 }
  0x3f   : > { %p6281_p2 = pneg %p6280_p1 }
  0x41   : > { %p6286_p4 = pnand %p6284_p3, %p6281_p2 }
  0x43   : > { %6289 = shalt.err (!%p6286_p4)
}
  0x44   : > { %s6290_s28 = scalar_lea.vmem %s6560_s0, 64  ;;  %p6298_p11 = scmp.lt.s32.totalorder %s6560_s0, %s6560_s0 }
  0x45   : > { %p6291_p5 = scmp.ne.s32.totalorder %s6560_s0, %s6290_s28  ;;  %p6299_p13 = scmp.lt.s32.totalorder %s6290_s28, %s6290_s28 }
  0x47   : > { %p6293_p6 = pnand %p6291_p5, %p6580_p12  ;;  %p6300_p0 = por %p6299_p13, %p6298_p11 }
  0x49   : > { %p6294_p9 = pneg %p6293_p6 }
  0x4b   : > { %p6301_p1 = pnand %p6300_p0, %p6294_p9 }
  0x4d   : > { %6304 = shalt.err (!%p6301_p1)
}
  0x4e   : > { %6148 = dma.hbm_to_vmem [thread:$0]  (!%p6564_p10), %s6999_s6, 64, %s6560_s0, [#allocation11]  }
  0x4f   : > { %s6305_s25 = scalar_lea.hbm %s6996_s3, 16 }
  0x50   : > { %p6306_p2 = scmp.ne.s32.totalorder %s6996_s3, %s6305_s25  ;;  %p6312_p5 = scmp.lt.u32.totalorder %s6305_s25, %s6996_s3 }
  0x52   : > { %p6308_p3 = pnand %p6306_p2, %p6580_p12 }
  0x54   : > { %p6309_p4 = pneg %p6308_p3 }
  0x56   : > { %p6314_p6 = pnand %p6312_p5, %p6309_p4 }
  0x58   : > { %6317 = shalt.err (!%p6314_p6)
}
  0x59   : > { %s6318_s0 = scalar_lea.vmem %s6568_s19, 16  ;;  %s6325_s28 = scalar_lea.vmem %s6568_s19, 32 }
  0x5a   : > { %p6319_p9 = scmp.ne.s32.totalorder %s6568_s19, %s6318_s0  ;;  %p6326_p0 = scmp.lt.s32.totalorder %s6568_s19, %s6568_s19 }
  0x5b   : > { %p6327_p1 = scmp.lt.s32.totalorder %s6325_s28, %s6318_s0 }
  0x5c   : > { %p6321_p11 = pnand %p6319_p9, %p6580_p12 }
  0x5d   : > { %p6328_p2 = por %p6327_p1, %p6326_p0 }
  0x5e   : > { %p6322_p13 = pneg %p6321_p11 }
  0x60   : > { %p6329_p3 = pnand %p6328_p2, %p6322_p13 }
  0x62   : > { %6332 = shalt.err (!%p6329_p3)
}
  0x63   : > { %6139 = dma.hbm_to_vmem [thread:$0]  (!%p6564_p10), %s6996_s3, 16, %s6568_s19, [#allocation6]  }
  0x64   : > { %s6333_s25 = scalar_lea.hbm %s6998_s5, 10240 }
  0x65   : > { %p6334_p4 = scmp.ne.s32.totalorder %s6998_s5, %s6333_s25  ;;  %p6340_p9 = scmp.lt.u32.totalorder %s6333_s25, %s6998_s5 }
  0x67   : > { %p6336_p5 = pnand %p6334_p4, %p6580_p12 }
  0x69   : > { %p6337_p6 = pneg %p6336_p5 }
  0x6b   : > { %p6342_p11 = pnand %p6340_p9, %p6337_p6 }
  0x6d   : > { %6345 = shalt.err (!%p6342_p11)
}
  0x6e   : > { %s6346_s0 = scalar_lea.vmem %s427_s21, 10240  ;;  %p6354_p2 = scmp.lt.s32.totalorder %s427_s21, %s427_s21 }
  0x6f   : > { %p6347_p13 = scmp.ne.s32.totalorder %s427_s21, %s6346_s0  ;;  %p6355_p3 = scmp.lt.s32.totalorder %s6346_s0, %s6346_s0 }
  0x71   : > { %p6349_p0 = pnand %p6347_p13, %p6580_p12  ;;  %p6356_p7 = por %p6355_p3, %p6354_p2 }
  0x73   : > { %p6350_p1 = pneg %p6349_p0 }
  0x75   : > { %p6357_p8 = pnand %p6356_p7, %p6350_p1 }
  0x77   : > { %6360 = shalt.err (!%p6357_p8)
}
  0x78   : > { %6145 = dma.hbm_to_vmem [thread:$0]  (!%p6564_p10), %s6998_s5, 10240, %s427_s21, [#allocation8], %s6448_s23, %s6448_s23, %s6449_s24  }
  0x79   : > { %s6450_s14 = smov [#allocation12]   ;;  %s6451_s16 = smov [#allocation13]  }
  0x7a   : > { %s451_s15 = sshll.u32 %s6450_s14, 4  ;;  %s467_s26 = sshll.u32 %s6451_s16, 4  ;;  %s452_s15 = int_to_ptr.vmem [resolvable:$true] %s451_s15  ;;  %s468_s26 = int_to_ptr.vmem [resolvable:$true] %s467_s26 }
  0x7b   : > { %s6361_s18 = scalar_lea.hbm %s7000_s7, 64 }
  0x7c   : > { %p6362_p7 = scmp.ne.s32.totalorder %s7000_s7, %s6361_s18  ;;  %p6368_p5 = scmp.lt.u32.totalorder %s6361_s18, %s7000_s7 }
  0x7e   : > { %p6364_p8 = pnand %p6362_p7, %p6580_p12 }
  0x80   : > { %p6365_p4 = pneg %p6364_p8 }
  0x82   : > { %p6370_p6 = pnand %p6368_p5, %p6365_p4 }
  0x84   : > { %6373 = shalt.err (!%p6370_p6)
}
  0x85   : > { %s6374_s21 = scalar_lea.vmem %s452_s15, 64  ;;  %p6382_p0 = scmp.lt.s32.totalorder %s452_s15, %s452_s15 }
  0x86   : > { %p6375_p9 = scmp.ne.s32.totalorder %s452_s15, %s6374_s21  ;;  %p6383_p1 = scmp.lt.s32.totalorder %s6374_s21, %s6374_s21 }
  0x88   : > { %p6377_p11 = pnand %p6375_p9, %p6580_p12  ;;  %p6384_p2 = por %p6383_p1, %p6382_p0 }
  0x8a   : > { %p6378_p13 = pneg %p6377_p11 }
  0x8c   : > { %p6385_p3 = pnand %p6384_p2, %p6378_p13 }
  0x8e   : > { %6388 = shalt.err (!%p6385_p3)
}
  0x8f   : > { %6151 = dma.hbm_to_vmem [thread:$0]  (!%p6564_p10), %s7000_s7, 64, %s452_s15, [#allocation11]  }
  0x90   : > { %s6389_s27 = scalar_lea.hbm %s7003_s10, 2048 }
  0x91   : > { %p6390_p7 = scmp.ne.s32.totalorder %s7003_s10, %s6389_s27  ;;  %p6396_p5 = scmp.lt.u32.totalorder %s6389_s27, %s7003_s10 }
  0x93   : > { %p6392_p8 = pnand %p6390_p7, %p6580_p12 }
  0x95   : > { %p6393_p4 = pneg %p6392_p8 }
  0x97   : > { %p6398_p6 = pnand %p6396_p5, %p6393_p4 }
  0x99   : > { %6401 = shalt.err (!%p6398_p6)
}
  0x9a   : > { %s6402_s19 = scalar_lea.vmem %s468_s26, 2048  ;;  %p6410_p0 = scmp.lt.s32.totalorder %s468_s26, %s468_s26 }
  0x9b   : > { %p6403_p9 = scmp.ne.s32.totalorder %s468_s26, %s6402_s19  ;;  %p6411_p1 = scmp.lt.s32.totalorder %s6402_s19, %s6402_s19 }
  0x9d   : > { %p6405_p11 = pnand %p6403_p9, %p6580_p12  ;;  %p6412_p2 = por %p6411_p1, %p6410_p0 }
  0x9f   : > { %p6406_p13 = pneg %p6405_p11 }
  0xa1   : > { %p6413_p3 = pnand %p6412_p2, %p6406_p13 }
  0xa3   : > { %6416 = shalt.err (!%p6413_p3)
}
  0xa4   : > { %6154 = dma.hbm_to_vmem [thread:$0]  (!%p6564_p10), %s7003_s10, 2048, %s468_s26, [#allocation14], %s6448_s23, %s6448_s23, %s6449_s24  }
  0xa5   : > { %p7024_p7 = scmp.ne.s32.totalorder %s7021_s29, 0 }
  0xa6   : > { %p7025_p12 = scmp.eq.s32.totalorder (!%p7024_p7), %s6547_s9, 0 }
  0xa7   : > { %507 = sbr.rel (%p7024_p7) target bundleno = 2946 (0xb82), region = 80 }
  0xae   : > { %6424 = dma.done.wait (%p7025_p12), [#allocation6], 16   ;;  %p7026_p8 = pmov %p7025_p12 }
  0xb0   : > { %6426 = vsyncadd (%p7026_p8), [#allocation6], 4294967280  ;;  %p7027_p4 = pmov %p7026_p8 }
  0xb2   : > { %6428 = dma.done.wait (%p7027_p4), [#allocation8], 20480   ;;  %p7028_p5 = pmov %p7027_p4 }
  0xb3   : > { %p7029_p6 = pmov %p7027_p4 }
  0xb4   : > { %6430 = vsyncadd (%p7028_p5), [#allocation8], 4294946816 }
  0xb5   : > { %6432 = dma.done.wait (%p7029_p6), [#allocation11], 128   ;;  %p7030_p10 = pmov %p7027_p4 }
  0xb6   : > { %p7031_p9 = pmov %p7027_p4 }
  0xb7   : > { %6434 = vsyncadd (%p7030_p10), [#allocation11], 4294967168 }
  0xb8   : > { %6436 = dma.done.wait (%p7031_p9), [#allocation14], 2048   ;;  %p7032_p11 = pmov %p7027_p4 }
  0xb9   : > { %s4800_s29 = sshll.u32 %s6547_s9, 1  ;;  %vm615_vm0 = vcmask 1043456   ;;  %vm608_vm1 = vcmask 31744   ;;  %v600_v0 = vld [vmem:[%s6995_s2] sm:$0xf]  ;;  %vm696_vm2 = vcmask 261120   ;;  %v588_v22 = vlaneseq }
  0xba   : > { %6438 = vsyncadd (%p7032_p11), [#allocation14], 4294965248  ;;  %p576_p13 = scmp.lt.s32.totalorder %s4800_s29, 3  ;;  %5201 = vmatprep.subr.msk.mxu0 %vm615_vm0, %v600_v0  ;;  %v6452_v3 = vmov 0.0   ;;  %v883_v4 = vld [vmem:[#allocation9 + $0x20] sm:$0xff]  ;;  %v884_v5 = vld [vmem:[#allocation9 + $0x28] sm:$0xff] }
  0xbb   : > { %5202 = vmatpush3.msk.msra.mxu0 %vm615_vm0, %v600_v0  ;;  %698 = vst.msk [vmem:[#allocation2 + $0x8] sm:$0xff] %vm696_vm2, %v6452_v3  ;;  %699 = vst.msk [vmem:[#allocation2 + $0x20] sm:$0xff] %vm696_vm2, %v6452_v3  ;;  %v716_v6 = vld [vmem:[#allocation7 + $0x20] sm:$0xff]  ;;  %v5706_v7 = vpack.c.bf16 %v884_v5, %v883_v4  ;;  %v717_v8 = vld [vmem:[#allocation7 + $0x28] sm:$0xff]  ;;  %s587_s14 = sld [smem:[#allocation4 + %s6547_s9]]  ;;  %v589_v23 = vshrl.u32 %v588_v22, 7 }
  0xbc   : > { %s7039_s29 = smov (!%p576_p13, %s4800_s29), 3  ;;  %v5690_v9 = vpack.c.bf16 %v717_v8, %v716_v6  ;;  %v885_v10 = vld [vmem:[#allocation9 + $0x30] sm:$0xff]  ;;  %v886_v11 = vld [vmem:[#allocation9 + $0x38] sm:$0xff]  ;;  %v709_v16 = vld [vmem:[#allocation9] sm:$0xff]  ;;  %s7033_s21 = sld [smem:[#allocation22_spill]] }
  0xbd   : > { %s4801_s17 = sshll.u32 %s7039_s29, 3  ;;  %v718_v12 = vld [vmem:[#allocation7 + $0x30] sm:$0xff]  ;;  %5707 = vmatprep.subr.bf16.mxu0 %v5706_v7  ;;  %v5710_v13 = vpack.c.bf16 %v886_v11, %v885_v10  ;;  %v719_v14 = vld [vmem:[#allocation7 + $0x38] sm:$0xff]  ;;  %v710_v17 = vld [vmem:[#allocation9 + $0x8] sm:$0xff]  ;;  %v590_v24 = vadd.s32 8, %v589_v23  ;;  %s7034_s25 = sld [smem:[#allocation23_spill]] }
  0xbe   : > { %s579_s24 = scalar_lea.vmem %s6994_s1, %s4801_s17  ;;  %5691 = vmatprep.subr.bf16.mxu1 %v5690_v9  ;;  %v5694_v15 = vpack.c.bf16 %v719_v14, %v718_v12  ;;  %v705_v18 = vld [vmem:[#allocation7] sm:$0xff]  ;;  %v5714_v19 = vpack.c.bf16 %v710_v17, %v709_v16  ;;  %v706_v20 = vld [vmem:[#allocation7 + $0x8] sm:$0xff]  ;;  %v4806_v26 = vld [vmem:[#allocation5] ss:$0 sm:$0xff]  ;;  %s7035_s20 = sld [smem:[#allocation24_spill]] }
  0xbf   : > { %v598_v1 = vld [vmem:[%s579_s24] sm:$0xff]  ;;  %v599_v2 = vld [vmem:[%s579_s24 + $0x8] sm:$0xff]  ;;  %5693 = vmatpush3.bf16.msra.mxu1 %v5690_v9  ;;  %v5698_v21 = vpack.c.bf16 %v706_v20, %v705_v18  ;;  %v1128_v41 = vld [vmem:[#allocation9 + $0x40] sm:$0xff]  ;;  %s7036_s19 = sld [smem:[#allocation25_spill]] }
  0xc0   : > { %5203 = vmatprep.mubr.msk.f32.mxu0 %vm608_vm1, %v598_v1  ;;  %5695 = vmatprep.subr.bf16.mxu1 %v5694_v15  ;;  %v711_v35 = vld [vmem:[#allocation9 + $0x10] sm:$0xff]  ;;  %v712_v36 = vld [vmem:[#allocation9 + $0x18] sm:$0xff]  ;;  %v1129_v44 = vld [vmem:[#allocation9 + $0x48] sm:$0xff] }
  0xc1   : > { %5204 = vmatmul.mubr.msk.f32.vlgmr.msra.gmra.mrb[0].mxu0 %vm608_vm1, %v599_v2  ;;  %v591_v25 = vstv %s587_s14  ;;  %v707_v37 = vld [vmem:[#allocation7 + $0x10] sm:$0xff]  ;;  %v708_v38 = vld [vmem:[#allocation7 + $0x18] sm:$0xff]  ;;  %v5718_v42 = vpack.c.bf16 %v712_v36, %v711_v35  ;;  %v1040_v45 = vld [vmem:[#allocation7 + $0x40] sm:$0xff]  ;;  %v5730_v48 = vpack.c.bf16 %v1129_v44, %v1128_v41 }
  0xc2   : > { %5709 = vmatpush3.bf16.msra.mxu0 %v5706_v7  ;;  %vm593_vm3 = vcmp.lt.s32.totalorder %v590_v24, %v591_v25  ;;  %vm592_vm4 = vcmp.lt.s32.totalorder %v589_v23, %v591_v25  ;;  %v5702_v43 = vpack.c.bf16 %v708_v38, %v707_v37  ;;  %v1041_v46 = vld [vmem:[#allocation7 + $0x48] sm:$0xff]  ;;  %v1130_v50 = vld [vmem:[#allocation9 + $0x50] sm:$0xff]  ;;  %v1131_v51 = vld [vmem:[#allocation9 + $0x58] sm:$0xff] }
  0xc3   : > { %5711 = vmatprep.subr.bf16.mxu0 %v5710_v13  ;;  %5697 = vmatpush3.bf16.msra.mxu1 %v5694_v15  ;;  %v6747_v27 = vsel %vm593_vm3, 1.0, %v6452_v3  ;;  %v6749_v30 = vsel %vm592_vm4, 1.0, %v6452_v3  ;;  %v5722_v49 = vpack.c.bf16 %v1041_v46, %v1040_v45  ;;  %v1042_v52 = vld [vmem:[#allocation7 + $0x50] sm:$0xff]  ;;  %v1043_v53 = vld [vmem:[#allocation7 + $0x58] sm:$0xff]  ;;  %v1300_v54 = vld [vmem:[#allocation9 + $0x60] sm:$0xff]  ;;  %v5734_v57 = vpack.c.bf16 %v1131_v51, %v1130_v50 }
  0xc4   : > { %5699 = vmatprep.subr.bf16.mxu1 %v5698_v21  ;;  %v1301_v55 = vld [vmem:[#allocation9 + $0x68] sm:$0xff]  ;;  %v5726_v58 = vpack.c.bf16 %v1043_v53, %v1042_v52  ;;  %v1212_v59 = vld [vmem:[#allocation7 + $0x60] sm:$0xff]  ;;  %v1302_v0 = vld [vmem:[#allocation9 + $0x70] sm:$0xff] }
  0xc5   : > { %v1213_v60 = vld [vmem:[#allocation7 + $0x68] sm:$0xff]  ;;  %v5746_v62 = vpack.c.bf16 %v1301_v55, %v1300_v54  ;;  %v1303_v1 = vld [vmem:[#allocation9 + $0x78] sm:$0xff]  ;;  %v1214_v2 = vld [vmem:[#allocation7 + $0x70] sm:$0xff]  ;;  %s585_s15 = scalar_lea.vmem %s7036_s19, %s4801_s17 }
  0xc6   : > { %5713 = vmatpush3.bf16.msra.mxu0 %v5710_v13  ;;  %v5738_v63 = vpack.c.bf16 %v1213_v60, %v1212_v59  ;;  %v1215_v3 = vld [vmem:[#allocation7 + $0x78] sm:$0xff]  ;;  %v1472_v4 = vld [vmem:[#allocation9 + $0x80] sm:$0xff]  ;;  %v1473_v5 = vld [vmem:[#allocation9 + $0x88] sm:$0xff]  ;;  %v5750_v7 = vpack.c.bf16 %v1303_v1, %v1302_v0 }
  0xc7   : > { %5715 = vmatprep.subr.bf16.mxu0 %v5714_v19  ;;  %v5742_v8 = vpack.c.bf16 %v1215_v3, %v1214_v2  ;;  %v1384_v9 = vld [vmem:[#allocation7 + $0x80] sm:$0xff]  ;;  %v1385_v10 = vld [vmem:[#allocation7 + $0x88] sm:$0xff]  ;;  %v5762_v12 = vpack.c.bf16 %v1473_v5, %v1472_v4  ;;  %v1474_v14 = vld [vmem:[#allocation9 + $0x90] sm:$0xff] }
  0xc8   : > { %v5754_v13 = vpack.c.bf16 %v1385_v10, %v1384_v9  ;;  %v1475_v15 = vld [vmem:[#allocation9 + $0x98] sm:$0xff]  ;;  %v1386_v16 = vld [vmem:[#allocation7 + $0x90] sm:$0xff]  ;;  %v1583_v23 = vld [vmem:[#allocation13] sm:$0xff] }
  0xc9   : > { %v1387_v17 = vld [vmem:[#allocation7 + $0x98] sm:$0xff]  ;;  %v1584_v24 = vld [vmem:[#allocation13 + $0x8] sm:$0xff]  ;;  %v1678_v37 = vld [vmem:[%s7001_s8 + $0x18] sm:$0xff] }
  0xca   : > { %v5758_v20 = vpack.c.bf16 %v1387_v17, %v1386_v16  ;;  %v1675_v25 = vld [vmem:[%s7001_s8] sm:$0xff]  ;;  %v1677_v36 = vld [vmem:[%s7001_s8 + $0x10] sm:$0xff] }
  0xcb   : > { %v5782_v38 = vpack.c.bf16 %v1678_v37, %v1677_v36  ;;  %v1781_v1 = vld [vmem:[#allocation7 + $0xc8] sm:$0xff]  ;;  %v1949_v2 = vld [vmem:[#allocation9 + $0xd0] sm:$0xff]  ;;  %v1950_v3 = vld [vmem:[#allocation9 + $0xd8] sm:$0xff] }
  0xcc   : > { %v5806_v5 = vpack.c.bf16 %v1950_v3, %v1949_v2  ;;  %v1773_v9 = vld [vmem:[#allocation9 + $0xa0] sm:$0xff]  ;;  %v1774_v10 = vld [vmem:[#allocation9 + $0xa8] sm:$0xff] }
  0xcd   : > { %v2104_v36 = vld [vmem:[#allocation7 + $0xe0] sm:$0xff]  ;;  %v2105_v37 = vld [vmem:[#allocation7 + $0xe8] sm:$0xff] }
 0x194   : > { %v5205_v28 = vpop.f32.mrb[0].mxu0 }
 0x195   : > { %v691_v29 = vadd.f32 %v5205_v28, %v4806_v26  ;;  %v685_v31 = vpop.f32.mrb[1].mxu0  ;;  %v1676_v28 = vld [vmem:[%s7001_s8 + $0x8] sm:$0xff] }
 0x196   : > { %v686_v32 = vadd.f32 %v4806_v26, %v685_v31  ;;  %v5770_v26 = vpack.c.bf16 %v1584_v24, %v1583_v23  ;;  %v1586_v31 = vld [vmem:[#allocation13 + $0x18] sm:$0xff]  ;;  %v1775_v24 = vld [vmem:[#allocation9 + $0xb0] sm:$0xff] }
 0x197   : > { %v6752_v33 = vmul.f32 %v6747_v27, %v691_v29  ;;  %v1585_v29 = vld [vmem:[#allocation13 + $0x10] sm:$0xff] }
 0x198   : > { %v6755_v34 = vmul.f32 %v6749_v30, %v686_v32  ;;  %v5778_v32 = vpack.c.bf16 %v1676_v28, %v1675_v25  ;;  %v5774_v35 = vpack.c.bf16 %v1586_v31, %v1585_v29  ;;  %v1776_v25 = vld [vmem:[#allocation9 + $0xb8] sm:$0xff]  ;;  %v2192_v31 = vld [vmem:[#allocation9 + $0xe0] sm:$0xff] }
 0x199   : > { %702 = vst.msk [vmem:[#allocation2 + $0x18] sm:$0xff] %vm696_vm2, %v6752_v33  ;;  %v1771_v28 = vld [vmem:[#allocation7 + $0xb8] sm:$0xff] }
 0x19a   : > { %701 = vst.msk [vmem:[#allocation2 + $0x10] sm:$0xff] %vm696_vm2, %v6755_v34 }
 0x1a0   : > { %v1038_v6 = vld [vmem:[#allocation2 + $0x18] sm:$0xff] }
 0x1a1   : > { %v713_v39 = vld [vmem:[#allocation2 + $0xf] sm:$0xff]  ;;  %v714_v40 = vld [vmem:[#allocation2 + $0x17] sm:$0xff] }
 0x1a2   : > { %5214 = vmatprep.mubr.msk.f32.mxu1 %vm696_vm2, %v713_v39  ;;  %5236 = vmatprep.mubr.msk.f32.mxu0 %vm696_vm2, %v713_v39  ;;  %v703_v47 = vld [vmem:[#allocation2 + $0xe] sm:$0xff]  ;;  %v704_v56 = vld [vmem:[#allocation2 + $0x16] sm:$0xff] }
 0x1a3   : > { %5215 = vmatmul.mubr.msk.f32.vlgmr.msra.gmra.mrb[0].mxu1 %vm696_vm2, %v714_v40  ;;  %5237 = vmatmul.mubr.msk.f32.vlgmr.msra.gmra.mrb[2].mxu0 %vm696_vm2, %v714_v40  ;;  %v1037_v61 = vld [vmem:[#allocation2 + $0x10] sm:$0xff]  ;;  %v1210_v18 = vld [vmem:[#allocation2 + $0x19] sm:$0xff] }
 0x1a4   : > { %5717 = vmatpush3.bf16.msra.mxu0 %v5714_v19  ;;  %5701 = vmatpush3.bf16.msra.mxu1 %v5698_v21  ;;  %v1209_v11 = vld [vmem:[#allocation2 + $0x11] sm:$0xff]  ;;  %v5766_v19 = vpack.c.bf16 %v1475_v15, %v1474_v14  ;;  %v1382_v22 = vld [vmem:[#allocation2 + $0x1a] sm:$0xff] }
 0x1a5   : > { %5225 = vmatprep.mubr.msk.f32.mxu1 %vm696_vm2, %v703_v47  ;;  %5247 = vmatprep.mubr.msk.f32.mxu0 %vm696_vm2, %v703_v47  ;;  %v1381_v21 = vld [vmem:[#allocation2 + $0x12] sm:$0xff]  ;;  %v4837_v15 = vld [vmem:[%s7033_s21] ss:$0 sm:$0xff] }
 0x1a6   : > { %5719 = vmatprep.subr.bf16.mxu0 %v5718_v42  ;;  %5703 = vmatprep.subr.bf16.mxu1 %v5702_v43  ;;  %v4831_v39 = vld [vmem:[#allocation12] ss:$0 sm:$0xff] }
 0x1a8   : > { %5721 = vmatpush3.bf16.msra.mxu0 %v5718_v42  ;;  %5705 = vmatpush3.bf16.msra.mxu1 %v5702_v43 }
 0x1a9   : > { %5731 = vmatprep.subr.bf16.mxu0 %v5730_v48  ;;  %5723 = vmatprep.subr.bf16.mxu1 %v5722_v49 }
 0x1ab   : > { %5226 = vmatmul.mubr.msk.f32.vlgmr.msra.gmra.mrb[0].mxu1 %vm696_vm2, %v704_v56  ;;  %5248 = vmatmul.mubr.msk.f32.vlgmr.msra.gmra.mrb[2].mxu0 %vm696_vm2, %v704_v56 }
 0x1ac   : > { %5733 = vmatpush3.bf16.msra.mxu0 %v5730_v48  ;;  %5725 = vmatpush3.bf16.msra.mxu1 %v5722_v49  ;;  %v4830_v48 = vld [vmem:[#allocation10] ss:$0 sm:$0xff] }
 0x1ad   : > { %5258 = vmatprep.mubr.msk.f32.mxu1 %vm696_vm2, %v1037_v61  ;;  %5269 = vmatprep.mubr.msk.f32.mxu0 %vm696_vm2, %v1037_v61  ;;  %v1947_v61 = vld [vmem:[#allocation9 + $0xc0] sm:$0xff] }
 0x1ae   : > { %5735 = vmatprep.subr.bf16.mxu0 %v5734_v57  ;;  %5727 = vmatprep.subr.bf16.mxu1 %v5726_v58 }
 0x1b0   : > { %5737 = vmatpush3.bf16.msra.mxu0 %v5734_v57  ;;  %5729 = vmatpush3.bf16.msra.mxu1 %v5726_v58 }
 0x1b1   : > { %5747 = vmatprep.subr.bf16.mxu0 %v5746_v62  ;;  %5739 = vmatprep.subr.bf16.mxu1 %v5738_v63 }
 0x1b3   : > { %5259 = vmatmul.mubr.msk.f32.vlgmr.msra.gmra.mrb[0].mxu1 %vm696_vm2, %v1038_v6  ;;  %5270 = vmatmul.mubr.msk.f32.vlgmr.msra.gmra.mrb[2].mxu0 %vm696_vm2, %v1038_v6  ;;  %v1782_v6 = vld [vmem:[#allocation7 + $0xd0] sm:$0xff] }
 0x1b4   : > { %5749 = vmatpush3.bf16.msra.mxu0 %v5746_v62  ;;  %5741 = vmatpush3.bf16.msra.mxu1 %v5738_v63  ;;  %v1948_v62 = vld [vmem:[#allocation9 + $0xc8] sm:$0xff]  ;;  %v1780_v63 = vld [vmem:[#allocation7 + $0xc0] sm:$0xff] }
 0x1b5   : > { %5280 = vmatprep.mubr.msk.f32.mxu1 %vm696_vm2, %v1209_v11  ;;  %5291 = vmatprep.mubr.msk.f32.mxu0 %vm696_vm2, %v1209_v11  ;;  %v5802_v0 = vpack.c.bf16 %v1948_v62, %v1947_v61  ;;  %v5786_v4 = vpack.c.bf16 %v1781_v1, %v1780_v63  ;;  %v1768_v11 = vld [vmem:[#allocation7 + $0xa0] sm:$0xff]  ;;  %v2449_v1 = vld [vmem:[#allocation7 + $0x128] sm:$0xff] }
 0x1b6   : > { %5751 = vmatprep.subr.bf16.mxu0 %v5750_v7  ;;  %5743 = vmatprep.subr.bf16.mxu1 %v5742_v8 }
 0x1b8   : > { %5753 = vmatpush3.bf16.msra.mxu0 %v5750_v7  ;;  %5745 = vmatpush3.bf16.msra.mxu1 %v5742_v8  ;;  %v1783_v7 = vld [vmem:[#allocation7 + $0xd8] sm:$0xff] }
 0x1b9   : > { %5763 = vmatprep.subr.bf16.mxu0 %v5762_v12  ;;  %5755 = vmatprep.subr.bf16.mxu1 %v5754_v13  ;;  %v5790_v8 = vpack.c.bf16 %v1783_v7, %v1782_v6  ;;  %v2539_v6 = vld [vmem:[#allocation9 + $0x138] sm:$0xff]  ;;  %v2450_v7 = vld [vmem:[#allocation7 + $0x130] sm:$0xff] }
 0x1bb   : > { %5281 = vmatmul.mubr.msk.f32.vlgmr.msra.gmra.mrb[0].mxu1 %vm696_vm2, %v1210_v18  ;;  %5292 = vmatmul.mubr.msk.f32.vlgmr.msra.gmra.mrb[2].mxu0 %vm696_vm2, %v1210_v18 }
 0x1bc   : > { %5765 = vmatpush3.bf16.msra.mxu0 %v5762_v12  ;;  %5757 = vmatpush3.bf16.msra.mxu1 %v5754_v13  ;;  %v5810_v12 = vpack.c.bf16 %v1774_v10, %v1773_v9  ;;  %v1769_v13 = vld [vmem:[#allocation7 + $0xa8] sm:$0xff] }
 0x1bd   : > { %5302 = vmatprep.mubr.msk.f32.mxu1 %vm696_vm2, %v1381_v21  ;;  %5313 = vmatprep.mubr.msk.f32.mxu0 %vm696_vm2, %v1381_v21  ;;  %v5794_v14 = vpack.c.bf16 %v1769_v13, %v1768_v11  ;;  %v2648_v13 = vld [vmem:[#allocation13 + $0x20] sm:$0xff] }
 0x1be   : > { %5767 = vmatprep.subr.bf16.mxu0 %v5766_v19  ;;  %5759 = vmatprep.subr.bf16.mxu1 %v5758_v20 }
 0x1c0   : > { %5769 = vmatpush3.bf16.msra.mxu0 %v5766_v19  ;;  %5761 = vmatpush3.bf16.msra.mxu1 %v5758_v20 }
 0x1c1   : > { %5771 = vmatprep.subr.bf16.mxu1 %v5770_v26  ;;  %5779 = vmatprep.subr.bf16.mxu0 %v5778_v32 }
 0x1c3   : > { %5303 = vmatmul.mubr.msk.f32.vlgmr.msra.gmra.mrb[0].mxu1 %vm696_vm2, %v1382_v22  ;;  %5314 = vmatmul.mubr.msk.f32.vlgmr.msra.gmra.mrb[2].mxu0 %vm696_vm2, %v1382_v22 }
 0x1c4   : > { %5773 = vmatpush3.bf16.msra.mxu1 %v5770_v26  ;;  %5781 = vmatpush3.bf16.msra.mxu0 %v5778_v32  ;;  %v1770_v26 = vld [vmem:[#allocation7 + $0xb0] sm:$0xff] }
 0x1c5   : > { %5775 = vmatprep.subr.bf16.mxu1 %v5774_v35  ;;  %5783 = vmatprep.subr.bf16.mxu0 %v5782_v38  ;;  %v5798_v32 = vpack.c.bf16 %v1771_v28, %v1770_v26  ;;  %v4861_v28 = vld [vmem:[#allocation12 + $0x1] ss:$0 sm:$0xff] }
 0x1c8   : > { %5777 = vmatpush3.bf16.msra.mxu1 %v5774_v35  ;;  %5785 = vmatpush3.bf16.msra.mxu0 %v5782_v38  ;;  %v2193_v35 = vld [vmem:[#allocation9 + $0xe8] sm:$0xff] }
 0x1c9   : > { %5803 = vmatprep.subr.bf16.mxu0 %v5802_v0  ;;  %5787 = vmatprep.subr.bf16.mxu1 %v5786_v4 }
 0x296   : > { %v5304_v40 = vpop.f32.mrb[0].mxu1  ;;  %v5315_v41 = vpop.f32.mrb[2].mxu0 }
 0x297   : > { %v1568_v42 = vadd.f32 %v5315_v41, %v4831_v39  ;;  %v1460_v43 = vpop.f32.mrb[1].mxu1  ;;  %v1542_v44 = vpop.f32.mrb[3].mxu0  ;;  %v1559_v49 = vadd.f32 %v5304_v40, %v4830_v48  ;;  %v5818_v40 = vpack.c.bf16 %v2105_v37, %v2104_v36  ;;  %v2194_v41 = vld [vmem:[#allocation9 + $0xf0] sm:$0xff] }
 0x298   : > { %v1567_v45 = vadd.f32 %v4831_v39, %v1542_v44  ;;  %v1558_v50 = vadd.f32 %v4830_v48, %v1460_v43  ;;  %v5826_v39 = vpack.c.bf16 %v2193_v35, %v2192_v31  ;;  %v2106_v43 = vld [vmem:[#allocation7 + $0xf0] sm:$0xff]  ;;  %v2107_v44 = vld [vmem:[#allocation7 + $0xf8] sm:$0xff] }
 0x299   : > { %v4833_v46 = vmul.f32 -1.442695, %v1568_v42  ;;  %v2195_v42 = vld [vmem:[#allocation9 + $0xf8] sm:$0xff] }
 0x29a   : > { %v4832_v47 = vmul.f32 -1.442695, %v1567_v45  ;;  %v2364_v45 = vld [vmem:[#allocation9 + $0x100] sm:$0xff]  ;;  %v5830_v48 = vpack.c.bf16 %v2195_v42, %v2194_v41 }
 0x29b   : > { %6185 = vpow2.f32 %v4833_v46  ;;  %v2365_v46 = vld [vmem:[#allocation9 + $0x108] sm:$0xff] }
 0x29c   : > { %6187 = vpow2.f32 %v4832_v47 }
 0x29d   : > { %6189 = vtanh.f32 %v1559_v49  ;;  %v5822_v49 = vpack.c.bf16 %v2107_v44, %v2106_v43 }
 0x29e   : > { %6191 = vtanh.f32 %v1558_v50  ;;  %v2276_v50 = vld [vmem:[#allocation7 + $0x100] sm:$0xff] }
 0x2a5   : > { %v6186_v51 = vpop.eup %6185 }
 0x2a6   : > { %v6188_v52 = vpop.eup %6187  ;;  %v1576_v53 = vadd.f32 1.0, %v6186_v51  ;;  %v2277_v51 = vld [vmem:[#allocation7 + $0x108] sm:$0xff] }
 0x2a7   : > { %v1575_v54 = vadd.f32 1.0, %v6188_v52  ;;  %v6190_v55 = vpop.eup %6189 }
 0x2a8   : > { %6193 = vrcp.f32 %v1576_v53  ;;  %v6192_v56 = vpop.eup %6191  ;;  %v5842_v53 = vpack.c.bf16 %v2365_v46, %v2364_v45 }
 0x2a9   : > { %6195 = vrcp.f32 %v1575_v54  ;;  %v5834_v54 = vpack.c.bf16 %v2277_v51, %v2276_v50  ;;  %v3013_v51 = vld [vmem:[#allocation9 + $0x160] sm:$0xff] }
 0x2b2   : > { %v6194_v57 = vpop.eup %6193 }
 0x2b3   : > { %v6196_v58 = vpop.eup %6195  ;;  %v1582_v59 = vmul.f32 %v6194_v57, %v6190_v55  ;;  %v2366_v55 = vld [vmem:[#allocation9 + $0x110] sm:$0xff] }
 0x2b4   : > { %v1581_v60 = vmul.f32 %v6196_v58, %v6192_v56  ;;  %v2367_v56 = vld [vmem:[#allocation9 + $0x118] sm:$0xff]  ;;  %v2278_v57 = vld [vmem:[#allocation7 + $0x110] sm:$0xff] }
 0x2b5   : > { %v2279_v58 = vld [vmem:[#allocation7 + $0x118] sm:$0xff]  ;;  %v5846_v62 = vpack.c.bf16 %v2367_v56, %v2366_v55  ;;  %v2847_v55 = vld [vmem:[#allocation7 + $0x168] sm:$0xff]  ;;  %v3015_v56 = vld [vmem:[#allocation9 + $0x170] sm:$0xff] }
 0x2b6   : > { %5324 = vmatprep.mubr.msk.f32.mxu1 %vm696_vm2, %v1581_v60  ;;  %5335 = vmatprep.mubr.msk.f32.mxu0 %vm696_vm2, %v1581_v60  ;;  %v2537_v60 = vld [vmem:[#allocation9 + $0x128] sm:$0xff]  ;;  %v5838_v63 = vpack.c.bf16 %v2279_v58, %v2278_v57  ;;  %v3016_v57 = vld [vmem:[#allocation9 + $0x178] sm:$0xff] }
 0x2b7   : > { %5325 = vmatmul.mubr.msk.f32.vlgmr.msra.gmra.mrb[2].mxu1 %vm696_vm2, %v1582_v59  ;;  %5336 = vmatmul.mubr.msk.f32.vlgmr.msra.gmra.mrb[4].mxu0 %vm696_vm2, %v1582_v59  ;;  %v2536_v59 = vld [vmem:[#allocation9 + $0x120] sm:$0xff] }
 0x2b8   : > { %5805 = vmatpush3.bf16.msra.mxu0 %v5802_v0  ;;  %5789 = vmatpush3.bf16.msra.mxu1 %v5786_v4  ;;  %v2448_v0 = vld [vmem:[#allocation7 + $0x120] sm:$0xff]  ;;  %v5858_v3 = vpack.c.bf16 %v2537_v60, %v2536_v59  ;;  %v5902_v59 = vpack.c.bf16 %v3016_v57, %v3015_v56  ;;  %v2848_v60 = vld [vmem:[#allocation7 + $0x170] sm:$0xff] }
 0x2b9   : > { %5807 = vmatprep.subr.bf16.mxu0 %v5806_v5  ;;  %5791 = vmatprep.subr.bf16.mxu1 %v5790_v8  ;;  %v5850_v4 = vpack.c.bf16 %v2449_v1, %v2448_v0  ;;  %v2840_v0 = vld [vmem:[#allocation9 + $0x148] sm:$0xff]  ;;  %v2834_v1 = vld [vmem:[#allocation7 + $0x140] sm:$0xff]  ;;  %v3604_v57 = vld [vmem:[#allocation9 + $0x1d0] sm:$0xff] }
 0x2bc   : > { %5809 = vmatpush3.bf16.msra.mxu0 %v5806_v5  ;;  %5793 = vmatpush3.bf16.msra.mxu1 %v5790_v8  ;;  %v2538_v5 = vld [vmem:[#allocation9 + $0x130] sm:$0xff]  ;;  %v2451_v8 = vld [vmem:[#allocation7 + $0x138] sm:$0xff] }
 0x2bd   : > { %5811 = vmatprep.subr.bf16.mxu0 %v5810_v12  ;;  %5795 = vmatprep.subr.bf16.mxu1 %v5794_v14  ;;  %v5862_v10 = vpack.c.bf16 %v2539_v6, %v2538_v5  ;;  %v5854_v11 = vpack.c.bf16 %v2451_v8, %v2450_v7  ;;  %v4871_v5 = vld [vmem:[%s7033_s21 + $0x1] ss:$0 sm:$0xff] }
 0x38a   : > { %v5337_v16 = vpop.f32.mrb[4].mxu0 }
 0x38b   : > { %v1756_v17 = vadd.f32 %v5337_v16, %v4837_v15  ;;  %v1750_v18 = vpop.f32.mrb[5].mxu0 }
 0x38c   : > { %v1751_v19 = vadd.f32 %v4837_v15, %v1750_v18  ;;  %v4867_v15 = vld [vmem:[%s7001_s8 + $0x20] sm:$0xff]  ;;  %v2650_v18 = vld [vmem:[#allocation13 + $0x30] sm:$0xff] }
 0x38d   : > { %v1760_v20 = vadd.f32 %v1756_v17, %v6752_v33  ;;  %v4868_v17 = vld [vmem:[%s7001_s8 + $0x28] sm:$0xff] }
 0x38e   : > { %v1759_v21 = vadd.f32 %v1751_v19, %v6755_v34  ;;  %v5814_v34 = vpack.c.bf16 %v1776_v25, %v1775_v24  ;;  %v2651_v19 = vld [vmem:[#allocation13 + $0x38] sm:$0xff] }
 0x38f   : > { %v6803_v22 = vmul.f32 %v6747_v27, %v1760_v20  ;;  %v5874_v20 = vpack.c.bf16 %v4868_v17, %v4867_v15  ;;  %v4869_v24 = vld [vmem:[%s7001_s8 + $0x30] sm:$0xff]  ;;  %v4870_v25 = vld [vmem:[%s7001_s8 + $0x38] sm:$0xff] }
 0x390   : > { %v6806_v23 = vmul.f32 %v6749_v30, %v1759_v21  ;;  %v5870_v21 = vpack.c.bf16 %v2651_v19, %v2650_v18  ;;  %v5878_v26 = vpack.c.bf16 %v4870_v25, %v4869_v24  ;;  %v2842_v15 = vld [vmem:[#allocation9 + $0x158] sm:$0xff]  ;;  %v3170_v24 = vld [vmem:[#allocation7 + $0x180] sm:$0xff]  ;;  %v3171_v25 = vld [vmem:[#allocation7 + $0x188] sm:$0xff] }
 0x391   : > { %1764 = vst.msk [vmem:[#allocation2 + $0x18] sm:$0xff] %vm696_vm2, %v6803_v22  ;;  %v2837_v17 = vld [vmem:[#allocation7 + $0x158] sm:$0xff] }
 0x392   : > { %1763 = vst.msk [vmem:[#allocation2 + $0x10] sm:$0xff] %vm696_vm2, %v6806_v23 }
 0x398   : > { %v2102_v61 = vld [vmem:[#allocation2 + $0x18] sm:$0xff] }
 0x399   : > { %v1777_v29 = vld [vmem:[#allocation2 + $0xe] sm:$0xff]  ;;  %v1778_v33 = vld [vmem:[#allocation2 + $0x16] sm:$0xff] }
 0x39a   : > { %5346 = vmatprep.mubr.msk.f32.mxu1 %vm696_vm2, %v1777_v29  ;;  %5368 = vmatprep.mubr.msk.f32.mxu0 %vm696_vm2, %v1777_v29  ;;  %v1765_v38 = vld [vmem:[#allocation2 + $0xc] sm:$0xff]  ;;  %v1766_v47 = vld [vmem:[#allocation2 + $0x14] sm:$0xff] }
 0x39b   : > { %5347 = vmatmul.mubr.msk.f32.vlgmr.msra.gmra.mrb[4].mxu1 %vm696_vm2, %v1778_v33  ;;  %5369 = vmatmul.mubr.msk.f32.vlgmr.msra.gmra.mrb[6].mxu0 %vm696_vm2, %v1778_v33  ;;  %v2101_v52 = vld [vmem:[#allocation2 + $0x10] sm:$0xff]  ;;  %v2274_v9 = vld [vmem:[#allocation2 + $0x1a] sm:$0xff] }
 0x39c   : > { %5813 = vmatpush3.bf16.msra.mxu0 %v5810_v12  ;;  %5797 = vmatpush3.bf16.msra.mxu1 %v5794_v14  ;;  %v2273_v2 = vld [vmem:[#allocation2 + $0x12] sm:$0xff]  ;;  %v2446_v12 = vld [vmem:[#allocation2 + $0x1c] sm:$0xff] }
 0x39d   : > { %5357 = vmatprep.mubr.msk.f32.mxu1 %vm696_vm2, %v1765_v38  ;;  %5379 = vmatprep.mubr.msk.f32.mxu0 %vm696_vm2, %v1765_v38  ;;  %v2649_v14 = vld [vmem:[#allocation13 + $0x28] sm:$0xff]  ;;  %v4860_v38 = vld [vmem:[#allocation10 + $0x1] ss:$0 sm:$0xff] }
 0x39e   : > { %5815 = vmatprep.subr.bf16.mxu0 %v5814_v34  ;;  %5799 = vmatprep.subr.bf16.mxu1 %v5798_v32  ;;  %v5866_v16 = vpack.c.bf16 %v2649_v14, %v2648_v13  ;;  %v2841_v14 = vld [vmem:[#allocation9 + $0x150] sm:$0xff] }
 0x3a0   : > { %5817 = vmatpush3.bf16.msra.mxu0 %v5814_v34  ;;  %5801 = vmatpush3.bf16.msra.mxu1 %v5798_v32 }
 0x3a1   : > { %5827 = vmatprep.subr.bf16.mxu0 %v5826_v39  ;;  %5819 = vmatprep.subr.bf16.mxu1 %v5818_v40 }
 0x3a3   : > { %5358 = vmatmul.mubr.msk.f32.vlgmr.msra.gmra.mrb[4].mxu1 %vm696_vm2, %v1766_v47  ;;  %5380 = vmatmul.mubr.msk.f32.vlgmr.msra.gmra.mrb[6].mxu0 %vm696_vm2, %v1766_v47 }
 0x3a4   : > { %5829 = vmatpush3.bf16.msra.mxu0 %v5826_v39  ;;  %5821 = vmatpush3.bf16.msra.mxu1 %v5818_v40 }
 0x3a5   : > { %5390 = vmatprep.mubr.msk.f32.mxu1 %vm696_vm2, %v2101_v52  ;;  %5401 = vmatprep.mubr.msk.f32.mxu0 %vm696_vm2, %v2101_v52  ;;  %v3014_v52 = vld [vmem:[#allocation9 + $0x168] sm:$0xff] }
 0x3a6   : > { %5831 = vmatprep.subr.bf16.mxu0 %v5830_v48  ;;  %5823 = vmatprep.subr.bf16.mxu1 %v5822_v49 }
 0x3a8   : > { %5833 = vmatpush3.bf16.msra.mxu0 %v5830_v48  ;;  %5825 = vmatpush3.bf16.msra.mxu1 %v5822_v49 }
 0x3a9   : > { %5843 = vmatprep.subr.bf16.mxu0 %v5842_v53  ;;  %5835 = vmatprep.subr.bf16.mxu1 %v5834_v54 }
 0x3ab   : > { %5391 = vmatmul.mubr.msk.f32.vlgmr.msra.gmra.mrb[4].mxu1 %vm696_vm2, %v2102_v61  ;;  %5402 = vmatmul.mubr.msk.f32.vlgmr.msra.gmra.mrb[6].mxu0 %vm696_vm2, %v2102_v61  ;;  %v2849_v61 = vld [vmem:[#allocation7 + $0x178] sm:$0xff] }
 0x3ac   : > { %5845 = vmatpush3.bf16.msra.mxu0 %v5842_v53  ;;  %5837 = vmatpush3.bf16.msra.mxu1 %v5834_v54  ;;  %v2846_v53 = vld [vmem:[#allocation7 + $0x160] sm:$0xff]  ;;  %v5898_v54 = vpack.c.bf16 %v3014_v52, %v3013_v51 }
 0x3ad   : > { %5412 = vmatprep.mubr.msk.f32.mxu1 %vm696_vm2, %v2273_v2  ;;  %5423 = vmatprep.mubr.msk.f32.mxu0 %vm696_vm2, %v2273_v2  ;;  %v5882_v58 = vpack.c.bf16 %v2847_v55, %v2846_v53  ;;  %v3514_v53 = vld [vmem:[#allocation7 + $0x1c0] sm:$0xff] }
 0x3ae   : > { %5847 = vmatprep.subr.bf16.mxu0 %v5846_v62  ;;  %5839 = vmatprep.subr.bf16.mxu1 %v5838_v63 }
 0x3b0   : > { %5849 = vmatpush3.bf16.msra.mxu0 %v5846_v62  ;;  %5841 = vmatpush3.bf16.msra.mxu1 %v5838_v63  ;;  %v5886_v62 = vpack.c.bf16 %v2849_v61, %v2848_v60  ;;  %v2839_v63 = vld [vmem:[#allocation9 + $0x140] sm:$0xff]  ;;  %v3517_v60 = vld [vmem:[#allocation7 + $0x1d8] sm:$0xff] }
 0x3b1   : > { %5859 = vmatprep.subr.bf16.mxu0 %v5858_v3  ;;  %5851 = vmatprep.subr.bf16.mxu1 %v5850_v4  ;;  %v5906_v2 = vpack.c.bf16 %v2840_v0, %v2839_v63  ;;  %v6891_v0 = vld [vmem:[#allocation2 + $0x20] sm:$0xff] }
 0x3b3   : > { %5413 = vmatmul.mubr.msk.f32.vlgmr.msra.gmra.mrb[4].mxu1 %vm696_vm2, %v2274_v9  ;;  %5424 = vmatmul.mubr.msk.f32.vlgmr.msra.gmra.mrb[6].mxu0 %vm696_vm2, %v2274_v9 }
 0x3b4   : > { %5861 = vmatpush3.bf16.msra.mxu0 %v5858_v3  ;;  %5853 = vmatpush3.bf16.msra.mxu1 %v5850_v4  ;;  %v2835_v3 = vld [vmem:[#allocation7 + $0x148] sm:$0xff] }
 0x3b5   : > { %5434 = vmatprep.mubr.msk.f32.mxu1 %vm696_vm2, %v1766_v47  ;;  %5445 = vmatprep.mubr.msk.f32.mxu0 %vm696_vm2, %v1766_v47  ;;  %v5890_v4 = vpack.c.bf16 %v2835_v3, %v2834_v1  ;;  %v3714_v1 = vld [vmem:[#allocation13 + $0x40] sm:$0xff] }
 0x3b6   : > { %5863 = vmatprep.subr.bf16.mxu0 %v5862_v10  ;;  %5855 = vmatprep.subr.bf16.mxu1 %v5854_v11  ;;  %v4901_v3 = vld [vmem:[%s7001_s8 + $0x40] sm:$0xff] }
 0x3b8   : > { %5865 = vmatpush3.bf16.msra.mxu0 %v5862_v10  ;;  %5857 = vmatpush3.bf16.msra.mxu1 %v5854_v11 }
 0x3b9   : > { %5867 = vmatprep.subr.bf16.mxu1 %v5866_v16  ;;  %5875 = vmatprep.subr.bf16.mxu0 %v5874_v20 }
 0x3bb   : > { %5435 = vmatmul.mubr.msk.f32.vlgmr.msra.gmra.mrb[4].mxu1 %vm696_vm2, %v2446_v12  ;;  %5446 = vmatmul.mubr.msk.f32.vlgmr.msra.gmra.mrb[6].mxu0 %vm696_vm2, %v2446_v12 }
 0x3bc   : > { %5869 = vmatpush3.bf16.msra.mxu1 %v5866_v16  ;;  %5877 = vmatpush3.bf16.msra.mxu0 %v5874_v20  ;;  %v2836_v16 = vld [vmem:[#allocation7 + $0x150] sm:$0xff]  ;;  %v3258_v20 = vld [vmem:[#allocation9 + $0x180] sm:$0xff] }
 0x3bd   : > { %5871 = vmatprep.subr.bf16.mxu1 %v5870_v21  ;;  %5879 = vmatprep.subr.bf16.mxu0 %v5878_v26  ;;  %v5894_v19 = vpack.c.bf16 %v2837_v17, %v2836_v16 }
 0x3c0   : > { %5873 = vmatpush3.bf16.msra.mxu1 %v5870_v21  ;;  %5881 = vmatpush3.bf16.msra.mxu0 %v5878_v26  ;;  %v3259_v21 = vld [vmem:[#allocation9 + $0x188] sm:$0xff]  ;;  %v6871_v26 = vld [vmem:[#allocation2 + $0x8] sm:$0xff] }
 0x3c1   : > { %5899 = vmatprep.subr.bf16.mxu0 %v5898_v54  ;;  %5883 = vmatprep.subr.bf16.mxu1 %v5882_v58 }
 0x48e   : > { %v5436_v29 = vpop.f32.mrb[4].mxu1  ;;  %v5447_v33 = vpop.f32.mrb[6].mxu0 }
 0x48f   : > { %v2632_v31 = vadd.f32 %v5447_v33, %v4861_v28  ;;  %v2524_v34 = vpop.f32.mrb[5].mxu1  ;;  %v2606_v32 = vpop.f32.mrb[7].mxu0  ;;  %v2623_v39 = vadd.f32 %v5436_v29, %v4860_v38  ;;  %v5914_v29 = vpack.c.bf16 %v3171_v25, %v3170_v24  ;;  %v3260_v33 = vld [vmem:[#allocation9 + $0x190] sm:$0xff]  ;;  %v4894_v24 = vld [vmem:[#allocation10 + $0x2] ss:$0 sm:$0xff] }
 0x490   : > { %v2631_v35 = vadd.f32 %v4861_v28, %v2606_v32  ;;  %v2622_v40 = vadd.f32 %v4860_v38, %v2524_v34  ;;  %v5922_v28 = vpack.c.bf16 %v3259_v21, %v3258_v20  ;;  %v3172_v34 = vld [vmem:[#allocation7 + $0x190] sm:$0xff]  ;;  %v3173_v32 = vld [vmem:[#allocation7 + $0x198] sm:$0xff] }
 0x491   : > { %v4863_v36 = vmul.f32 -1.442695, %v2632_v31  ;;  %v3261_v31 = vld [vmem:[#allocation9 + $0x198] sm:$0xff] }
 0x492   : > { %v4862_v37 = vmul.f32 -1.442695, %v2631_v35  ;;  %v3430_v35 = vld [vmem:[#allocation9 + $0x1a0] sm:$0xff]  ;;  %v5926_v38 = vpack.c.bf16 %v3261_v31, %v3260_v33 }
 0x493   : > { %6197 = vpow2.f32 %v4863_v36  ;;  %v3431_v36 = vld [vmem:[#allocation9 + $0x1a8] sm:$0xff] }
 0x494   : > { %6199 = vpow2.f32 %v4862_v37 }
 0x495   : > { %6201 = vtanh.f32 %v2623_v39  ;;  %v5918_v39 = vpack.c.bf16 %v3173_v32, %v3172_v34 }
 0x496   : > { %6203 = vtanh.f32 %v2622_v40  ;;  %v3342_v40 = vld [vmem:[#allocation7 + $0x1a0] sm:$0xff] }
 0x49d   : > { %v6198_v41 = vpop.eup %6197 }
 0x49e   : > { %v6200_v42 = vpop.eup %6199  ;;  %v2640_v43 = vadd.f32 1.0, %v6198_v41  ;;  %v3343_v41 = vld [vmem:[#allocation7 + $0x1a8] sm:$0xff] }
 0x49f   : > { %v2639_v44 = vadd.f32 1.0, %v6200_v42  ;;  %v6202_v45 = vpop.eup %6201  ;;  %v5938_v42 = vpack.c.bf16 %v3431_v36, %v3430_v35 }
 0x4a0   : > { %6205 = vrcp.f32 %v2640_v43  ;;  %v6204_v46 = vpop.eup %6203  ;;  %v5930_v43 = vpack.c.bf16 %v3343_v41, %v3342_v40  ;;  %v4075_v40 = vld [vmem:[#allocation9 + $0x220] sm:$0xff]  ;;  %v4076_v41 = vld [vmem:[#allocation9 + $0x228] sm:$0xff] }
 0x4a1   : > { %6207 = vrcp.f32 %v2639_v44  ;;  %v3432_v44 = vld [vmem:[#allocation9 + $0x1b0] sm:$0xff] }
 0x4aa   : > { %v6206_v47 = vpop.eup %6205 }
 0x4ab   : > { %v6208_v48 = vpop.eup %6207  ;;  %v2646_v49 = vmul.f32 %v6206_v47, %v6202_v45  ;;  %v3433_v45 = vld [vmem:[#allocation9 + $0x1b8] sm:$0xff] }
 0x4ac   : > { %v2645_v50 = vmul.f32 %v6208_v48, %v6204_v46  ;;  %v3344_v46 = vld [vmem:[#allocation7 + $0x1b0] sm:$0xff]  ;;  %v3345_v47 = vld [vmem:[#allocation7 + $0x1b8] sm:$0xff]  ;;  %v3602_v48 = vld [vmem:[#allocation9 + $0x1c0] sm:$0xff]  ;;  %v5942_v51 = vpack.c.bf16 %v3433_v45, %v3432_v44 }
 0x4ad   : > { %v5934_v52 = vpack.c.bf16 %v3345_v47, %v3344_v46  ;;  %v3912_v44 = vld [vmem:[#allocation7 + $0x228] sm:$0xff]  ;;  %v4077_v45 = vld [vmem:[#allocation9 + $0x230] sm:$0xff]  ;;  %v4078_v46 = vld [vmem:[#allocation9 + $0x238] sm:$0xff] }
 0x4ae   : > { %5456 = vmatprep.mubr.msk.f32.mxu1 %vm696_vm2, %v2645_v50  ;;  %5467 = vmatprep.mubr.msk.f32.mxu0 %vm696_vm2, %v2645_v50 }
 0x4af   : > { %5457 = vmatmul.mubr.msk.f32.vlgmr.msra.gmra.mrb[2].mxu1 %vm696_vm2, %v2646_v49  ;;  %5468 = vmatmul.mubr.msk.f32.vlgmr.msra.gmra.mrb[8].mxu0 %vm696_vm2, %v2646_v49  ;;  %v3603_v49 = vld [vmem:[#allocation9 + $0x1c8] sm:$0xff] }
 0x4b0   : > { %5901 = vmatpush3.bf16.msra.mxu0 %v5898_v54  ;;  %5885 = vmatpush3.bf16.msra.mxu1 %v5882_v58  ;;  %v3515_v54 = vld [vmem:[#allocation7 + $0x1c8] sm:$0xff]  ;;  %v5954_v55 = vpack.c.bf16 %v3603_v49, %v3602_v48  ;;  %v3605_v58 = vld [vmem:[#allocation9 + $0x1d8] sm:$0xff]  ;;  %v5998_v48 = vpack.c.bf16 %v4078_v46, %v4077_v45  ;;  %v3913_v49 = vld [vmem:[#allocation7 + $0x230] sm:$0xff] }
 0x4b1   : > { %5903 = vmatprep.subr.bf16.mxu0 %v5902_v59  ;;  %5887 = vmatprep.subr.bf16.mxu1 %v5886_v62  ;;  %v5946_v56 = vpack.c.bf16 %v3515_v54, %v3514_v53  ;;  %v3906_v53 = vld [vmem:[#allocation9 + $0x208] sm:$0xff]  ;;  %v3900_v54 = vld [vmem:[#allocation7 + $0x200] sm:$0xff] }
 0x4b4   : > { %5905 = vmatpush3.bf16.msra.mxu0 %v5902_v59  ;;  %5889 = vmatpush3.bf16.msra.mxu1 %v5886_v62  ;;  %v3516_v59 = vld [vmem:[#allocation7 + $0x1d0] sm:$0xff]  ;;  %v5958_v62 = vpack.c.bf16 %v3605_v58, %v3604_v57 }
 0x4b5   : > { %5907 = vmatprep.subr.bf16.mxu0 %v5906_v2  ;;  %5891 = vmatprep.subr.bf16.mxu1 %v5890_v4  ;;  %v5950_v63 = vpack.c.bf16 %v3517_v60, %v3516_v59  ;;  %v4905_v58 = vld [vmem:[%s7033_s21 + $0x2] ss:$0 sm:$0xff] }
 0x582   : > { %v5469_v6 = vpop.f32.mrb[8].mxu0 }
 0x583   : > { %v2822_v7 = vadd.f32 %v5469_v6, %v4871_v5  ;;  %v2816_v8 = vpop.f32.mrb[9].mxu0  ;;  %v3716_v6 = vld [vmem:[#allocation13 + $0x50] sm:$0xff] }
 0x584   : > { %v2817_v9 = vadd.f32 %v4871_v5, %v2816_v8  ;;  %v4902_v5 = vld [vmem:[%s7001_s8 + $0x48] sm:$0xff] }
 0x585   : > { %v2826_v10 = vadd.f32 %v2822_v7, %v6803_v22  ;;  %v3717_v7 = vld [vmem:[#allocation13 + $0x58] sm:$0xff]  ;;  %v5970_v8 = vpack.c.bf16 %v4902_v5, %v4901_v3  ;;  %v3908_v5 = vld [vmem:[#allocation9 + $0x218] sm:$0xff] }
 0x586   : > { %v2825_v11 = vadd.f32 %v2817_v9, %v6806_v23  ;;  %v5910_v23 = vpack.c.bf16 %v2842_v15, %v2841_v14  ;;  %v5966_v9 = vpack.c.bf16 %v3717_v7, %v3716_v6  ;;  %v4895_v15 = vld [vmem:[#allocation12 + $0x2] ss:$0 sm:$0xff]  ;;  %v3902_v6 = vld [vmem:[#allocation7 + $0x210] sm:$0xff]  ;;  %v3903_v7 = vld [vmem:[#allocation7 + $0x218] sm:$0xff] }
 0x587   : > { %v6854_v12 = vmul.f32 %v6747_v27, %v2826_v10  ;;  %v4903_v10 = vld [vmem:[%s7001_s8 + $0x50] sm:$0xff] }
 0x588   : > { %v6857_v13 = vmul.f32 %v6749_v30, %v2825_v11  ;;  %v4904_v11 = vld [vmem:[%s7001_s8 + $0x58] sm:$0xff] }
 0x589   : > { %2830 = vst.msk [vmem:[#allocation2 + $0x18] sm:$0xff] %vm696_vm2, %v6854_v12  ;;  %v5974_v14 = vpack.c.bf16 %v4904_v11, %v4903_v10  ;;  %v5990_v10 = vpack.c.bf16 %v3903_v7, %v3902_v6  ;;  %v4320_v11 = vld [vmem:[#allocation9 + $0x240] sm:$0xff] }
 0x58a   : > { %2829 = vst.msk [vmem:[#allocation2 + $0x10] sm:$0xff] %vm696_vm2, %v6857_v13 }
 0x590   : > { %v3168_v50 = vld [vmem:[#allocation2 + $0x18] sm:$0xff] }
 0x591   : > { %v2843_v18 = vld [vmem:[#allocation2 + $0xc] sm:$0xff]  ;;  %v6863_v22 = vld [vmem:[#allocation2 + $0x14] sm:$0xff]  ;;  %v3340_v61 = vld [vmem:[#allocation2 + $0x1c] sm:$0xff] }
 0x592   : > { %5478 = vmatprep.mubr.msk.f32.mxu1 %vm696_vm2, %v2843_v18  ;;  %5500 = vmatprep.mubr.msk.f32.mxu0 %vm696_vm2, %v2843_v18  ;;  %v2832_v37 = vld [vmem:[#allocation2 + $0x10] sm:$0xff] }
 0x593   : > { %5479 = vmatmul.mubr.msk.f32.vlgmr.msra.gmra.mrb[6].mxu1 %vm696_vm2, %v6863_v22  ;;  %5501 = vmatmul.mubr.msk.f32.vlgmr.msra.gmra.mrb[10].mxu0 %vm696_vm2, %v6863_v22 }
 0x594   : > { %5909 = vmatpush3.bf16.msra.mxu0 %v5906_v2  ;;  %5893 = vmatpush3.bf16.msra.mxu1 %v5890_v4  ;;  %v3715_v2 = vld [vmem:[#allocation13 + $0x48] sm:$0xff] }
 0x595   : > { %5911 = vmatprep.subr.bf16.mxu0 %v5910_v23  ;;  %5895 = vmatprep.subr.bf16.mxu1 %v5894_v19  ;;  %v5962_v4 = vpack.c.bf16 %v3715_v2, %v3714_v1 }
 0x596   : > { %5489 = vmatprep.mubr.msk.f32.mxu1 %vm696_vm2, %v6871_v26  ;;  %5511 = vmatprep.mubr.msk.f32.mxu0 %vm696_vm2, %v6871_v26 }
 0x598   : > { %5913 = vmatpush3.bf16.msra.mxu0 %v5910_v23  ;;  %5897 = vmatpush3.bf16.msra.mxu1 %v5894_v19 }
 0x599   : > { %5923 = vmatprep.subr.bf16.mxu0 %v5922_v28  ;;  %5915 = vmatprep.subr.bf16.mxu1 %v5914_v29 }
 0x59b   : > { %5490 = vmatmul.mubr.msk.f32.vlgmr.msra.gmra.mrb[6].mxu1 %vm696_vm2, %v2832_v37  ;;  %5512 = vmatmul.mubr.msk.f32.vlgmr.msra.gmra.mrb[10].mxu0 %vm696_vm2, %v2832_v37 }
 0x59c   : > { %5925 = vmatpush3.bf16.msra.mxu0 %v5922_v28  ;;  %5917 = vmatpush3.bf16.msra.mxu1 %v5914_v29 }
 0x59d   : > { %5522 = vmatprep.mubr.msk.f32.mxu1 %vm696_vm2, %v2832_v37  ;;  %5533 = vmatprep.mubr.msk.f32.mxu0 %vm696_vm2, %v2832_v37 }
 0x59e   : > { %5927 = vmatprep.subr.bf16.mxu0 %v5926_v38  ;;  %5919 = vmatprep.subr.bf16.mxu1 %v5918_v39 }
 0x5a0   : > { %5929 = vmatpush3.bf16.msra.mxu0 %v5926_v38  ;;  %5921 = vmatpush3.bf16.msra.mxu1 %v5918_v39 }
 0x5a1   : > { %5939 = vmatprep.subr.bf16.mxu0 %v5938_v42  ;;  %5931 = vmatprep.subr.bf16.mxu1 %v5930_v43 }
 0x5a3   : > { %5523 = vmatmul.mubr.msk.f32.vlgmr.msra.gmra.mrb[6].mxu1 %vm696_vm2, %v3168_v50  ;;  %5534 = vmatmul.mubr.msk.f32.vlgmr.msra.gmra.mrb[10].mxu0 %vm696_vm2, %v3168_v50 }
 0x5a4   : > { %5941 = vmatpush3.bf16.msra.mxu0 %v5938_v42  ;;  %5933 = vmatpush3.bf16.msra.mxu1 %v5930_v43  ;;  %v3911_v42 = vld [vmem:[#allocation7 + $0x220] sm:$0xff]  ;;  %v5994_v43 = vpack.c.bf16 %v4076_v41, %v4075_v40 }
 0x5a5   : > { %5544 = vmatprep.mubr.msk.f32.mxu1 %vm696_vm2, %v6863_v22  ;;  %5555 = vmatprep.mubr.msk.f32.mxu0 %vm696_vm2, %v6863_v22  ;;  %v5978_v47 = vpack.c.bf16 %v3912_v44, %v3911_v42 }
 0x5a6   : > { %5943 = vmatprep.subr.bf16.mxu0 %v5942_v51  ;;  %5935 = vmatprep.subr.bf16.mxu1 %v5934_v52 }
 0x5a8   : > { %5945 = vmatpush3.bf16.msra.mxu0 %v5942_v51  ;;  %5937 = vmatpush3.bf16.msra.mxu1 %v5934_v52  ;;  %v3905_v52 = vld [vmem:[#allocation9 + $0x200] sm:$0xff] }
 0x5a9   : > { %5955 = vmatprep.subr.bf16.mxu0 %v5954_v55  ;;  %5947 = vmatprep.subr.bf16.mxu1 %v5946_v56 }
 0x5ab   : > { %5545 = vmatmul.mubr.msk.f32.vlgmr.msra.gmra.mrb[6].mxu1 %vm696_vm2, %v3340_v61  ;;  %5556 = vmatmul.mubr.msk.f32.vlgmr.msra.gmra.mrb[10].mxu0 %vm696_vm2, %v3340_v61 }
 0x5ac   : > { %5957 = vmatpush3.bf16.msra.mxu0 %v5954_v55  ;;  %5949 = vmatpush3.bf16.msra.mxu1 %v5946_v56  ;;  %v6002_v55 = vpack.c.bf16 %v3906_v53, %v3905_v52  ;;  %v3901_v56 = vld [vmem:[#allocation7 + $0x208] sm:$0xff] }
 0x5ad   : > { %5566 = vmatprep.mubr.msk.f32.mxu1 %vm696_vm2, %v3168_v50  ;;  %5577 = vmatprep.mubr.msk.f32.mxu0 %vm696_vm2, %v3168_v50  ;;  %v3914_v50 = vld [vmem:[#allocation7 + $0x238] sm:$0xff]  ;;  %v5986_v57 = vpack.c.bf16 %v3901_v56, %v3900_v54  ;;  %v4526_v53 = vld [vmem:[%s7005_s12] sm:$0xff] }
 0x5ae   : > { %5959 = vmatprep.subr.bf16.mxu0 %v5958_v62  ;;  %5951 = vmatprep.subr.bf16.mxu1 %v5950_v63  ;;  %v5982_v51 = vpack.c.bf16 %v3914_v50, %v3913_v49  ;;  %v4527_v54 = vld [vmem:[%s7005_s12 + $0x8] sm:$0xff]  ;;  %v4528_v56 = vld [vmem:[%s7005_s12 + $0x10] sm:$0xff] }
 0x5b0   : > { %5961 = vmatpush3.bf16.msra.mxu0 %v5958_v62  ;;  %5953 = vmatpush3.bf16.msra.mxu1 %v5950_v63 }
 0x5b1   : > { %5963 = vmatprep.subr.bf16.mxu1 %v5962_v4  ;;  %5971 = vmatprep.subr.bf16.mxu0 %v5970_v8 }
 0x5b3   : > { %5567 = vmatmul.mubr.msk.f32.vlgmr.msra.gmra.mrb[6].mxu1 %vm696_vm2, %v6891_v0  ;;  %5578 = vmatmul.mubr.msk.f32.vlgmr.msra.gmra.mrb[10].mxu0 %vm696_vm2, %v6891_v0 }
 0x5b4   : > { %5965 = vmatpush3.bf16.msra.mxu1 %v5962_v4  ;;  %5973 = vmatpush3.bf16.msra.mxu0 %v5970_v8  ;;  %v3907_v4 = vld [vmem:[#allocation9 + $0x210] sm:$0xff] }
 0x5b5   : > { %5967 = vmatprep.subr.bf16.mxu1 %v5966_v9  ;;  %5975 = vmatprep.subr.bf16.mxu0 %v5974_v14 }
 0x5b8   : > { %5969 = vmatpush3.bf16.msra.mxu1 %v5966_v9  ;;  %5977 = vmatpush3.bf16.msra.mxu0 %v5974_v14  ;;  %v6006_v9 = vpack.c.bf16 %v3908_v5, %v3907_v4  ;;  %v4321_v14 = vld [vmem:[#allocation9 + $0x248] sm:$0xff] }
 0x5b9   : > { %5995 = vmatprep.subr.bf16.mxu0 %v5994_v43  ;;  %5979 = vmatprep.subr.bf16.mxu1 %v5978_v47 }
 0x686   : > { %v5568_v16 = vpop.f32.mrb[6].mxu1  ;;  %v5579_v17 = vpop.f32.mrb[10].mxu0 }
 0x687   : > { %v3698_v18 = vadd.f32 %v5579_v17, %v4895_v15  ;;  %v3590_v22 = vpop.f32.mrb[7].mxu1  ;;  %v3672_v23 = vpop.f32.mrb[11].mxu0  ;;  %v3689_v25 = vadd.f32 %v5568_v16, %v4894_v24  ;;  %v6018_v16 = vpack.c.bf16 %v4321_v14, %v4320_v11 }
 0x688   : > { %v3697_v19 = vadd.f32 %v4895_v15, %v3672_v23  ;;  %v3688_v28 = vadd.f32 %v4894_v24, %v3590_v22  ;;  %v4233_v15 = vld [vmem:[#allocation7 + $0x248] sm:$0xff]  ;;  %v4323_v22 = vld [vmem:[#allocation9 + $0x258] sm:$0xff]  ;;  %v4234_v23 = vld [vmem:[#allocation7 + $0x250] sm:$0xff] }
 0x689   : > { %v4897_v20 = vmul.f32 -1.442695, %v3698_v18  ;;  %v4322_v18 = vld [vmem:[#allocation9 + $0x250] sm:$0xff] }
 0x68a   : > { %v4896_v21 = vmul.f32 -1.442695, %v3697_v19  ;;  %v4235_v19 = vld [vmem:[#allocation7 + $0x258] sm:$0xff]  ;;  %v4433_v24 = vld [vmem:[#allocation13 + $0x68] sm:$0xff] }
 0x68b   : > { %6209 = vpow2.f32 %v4897_v20  ;;  %v6022_v20 = vpack.c.bf16 %v4323_v22, %v4322_v18 }
 0x68c   : > { %6211 = vpow2.f32 %v4896_v21  ;;  %v6014_v21 = vpack.c.bf16 %v4235_v19, %v4234_v23 }
 0x68d   : > { %6213 = vtanh.f32 %v3689_v25  ;;  %v4434_v25 = vld [vmem:[#allocation13 + $0x70] sm:$0xff] }
 0x68e   : > { %6215 = vtanh.f32 %v3688_v28 }
 0x695   : > { %v6210_v29 = vpop.eup %6209 }
 0x696   : > { %v6212_v33 = vpop.eup %6211  ;;  %v3706_v31 = vadd.f32 1.0, %v6210_v29  ;;  %v4435_v29 = vld [vmem:[#allocation13 + $0x78] sm:$0xff] }
 0x697   : > { %v3705_v34 = vadd.f32 1.0, %v6212_v33  ;;  %v6214_v32 = vpop.eup %6213  ;;  %v6030_v33 = vpack.c.bf16 %v4435_v29, %v4434_v25 }
 0x698   : > { %6217 = vrcp.f32 %v3706_v31  ;;  %v6216_v35 = vpop.eup %6215  ;;  %v4921_v31 = vld [vmem:[#allocation12 + $0x3] ss:$0 sm:$0xff] }
 0x699   : > { %6219 = vrcp.f32 %v3705_v34 }
 0x6a2   : > { %v6218_v36 = vpop.eup %6217 }
 0x6a3   : > { %v6220_v37 = vpop.eup %6219  ;;  %v3712_v38 = vmul.f32 %v6218_v36, %v6214_v32 }
 0x6a4   : > { %v3711_v39 = vmul.f32 %v6220_v37, %v6216_v35 }
 0x6a6   : > { %5588 = vmatprep.mubr.msk.f32.mxu1 %vm696_vm2, %v3711_v39  ;;  %5599 = vmatprep.mubr.msk.f32.mxu0 %vm696_vm2, %v3711_v39 }
 0x6a7   : > { %5589 = vmatmul.mubr.msk.f32.vlgmr.msra.gmra.mrb[2].mxu1 %vm696_vm2, %v3712_v38  ;;  %5600 = vmatmul.mubr.msk.f32.vlgmr.msra.gmra.mrb[12].mxu0 %vm696_vm2, %v3712_v38 }
 0x6a8   : > { %5997 = vmatpush3.bf16.msra.mxu0 %v5994_v43  ;;  %5981 = vmatpush3.bf16.msra.mxu1 %v5978_v47 }
 0x6a9   : > { %5999 = vmatprep.subr.bf16.mxu0 %v5998_v48  ;;  %5983 = vmatprep.subr.bf16.mxu1 %v5982_v51 }
 0x6ac   : > { %6001 = vmatpush3.bf16.msra.mxu0 %v5998_v48  ;;  %5985 = vmatpush3.bf16.msra.mxu1 %v5982_v51 }
 0x6ad   : > { %6003 = vmatprep.subr.bf16.mxu0 %v6002_v55  ;;  %5987 = vmatprep.subr.bf16.mxu1 %v5986_v57 }
 0x77a   : > { %v5601_v59 = vpop.f32.mrb[12].mxu0 }
 0x77b   : > { %v3888_v60 = vadd.f32 %v5601_v59, %v4905_v58  ;;  %v3882_v61 = vpop.f32.mrb[13].mxu0  ;;  %v4834_v59 = vld [vmem:[%s7004_s11] ss:$0 sm:$0xff] }
 0x77c   : > { %v3883_v62 = vadd.f32 %v4905_v58, %v3882_v61 }
 0x77d   : > { %v3892_v63 = vadd.f32 %v3888_v60, %v6854_v12  ;;  %v4864_v60 = vld [vmem:[%s7004_s11 + $0x1] ss:$0 sm:$0xff] }
 0x77e   : > { %v3891_v1 = vadd.f32 %v3883_v62, %v6857_v13  ;;  %v4232_v13 = vld [vmem:[#allocation7 + $0x240] sm:$0xff]  ;;  %v6046_v61 = vadd.f32 %v4864_v60, %v4834_v59  ;;  %v4898_v62 = vld [vmem:[%s7004_s11 + $0x2] ss:$0 sm:$0xff] }
 0x77f   : > { %v3894_v2 = vmul.f32 %v6747_v27, %v3892_v63  ;;  %v6010_v17 = vpack.c.bf16 %v4233_v15, %v4232_v13 }
 0x780   : > { %v3893_v3 = vmul.f32 %v6749_v30, %v3891_v1  ;;  %v6047_v63 = vadd.f32 %v6046_v61, %v4898_v62 }
 0x781   : > { %3896 = vst.msk [vmem:[#allocation2 + $0x18] sm:$0xff] %vm696_vm2, %v3894_v2  ;;  %v4924_v2 = vld [vmem:[%s7004_s11 + $0x3] ss:$0 sm:$0xff] }
 0x782   : > { %3895 = vst.msk [vmem:[#allocation2 + $0x10] sm:$0xff] %vm696_vm2, %v3893_v3 }
 0x788   : > { %v3909_v12 = vld [vmem:[#allocation2 + $0x18] sm:$0xff] }
 0x789   : > { %v3898_v8 = vld [vmem:[#allocation2 + $0x10] sm:$0xff] }
 0x78a   : > { %5610 = vmatprep.mubr.msk.f32.mxu1 %vm696_vm2, %v3898_v8  ;;  %5632 = vmatprep.mubr.msk.f32.mxu0 %vm696_vm2, %v3898_v8 }
 0x78b   : > { %5611 = vmatmul.mubr.msk.f32.vlgmr.msra.gmra.mrb[8].mxu1 %vm696_vm2, %v3909_v12  ;;  %5633 = vmatmul.mubr.msk.f32.vlgmr.msra.gmra.mrb[14].mxu0 %vm696_vm2, %v3909_v12 }
 0x78c   : > { %6005 = vmatpush3.bf16.msra.mxu0 %v6002_v55  ;;  %5989 = vmatpush3.bf16.msra.mxu1 %v5986_v57  ;;  %v6034_v55 = vpack.c.bf16 %v4527_v54, %v4526_v53  ;;  %v4529_v57 = vld [vmem:[%s7005_s12 + $0x18] sm:$0xff] }
 0x78d   : > { %6007 = vmatprep.subr.bf16.mxu0 %v6006_v9  ;;  %5991 = vmatprep.subr.bf16.mxu1 %v5990_v10  ;;  %v6038_v58 = vpack.c.bf16 %v4529_v57, %v4528_v56 }
 0x78e   : > { %5621 = vmatprep.mubr.msk.f32.mxu1 %vm696_vm2, %v6871_v26  ;;  %5643 = vmatprep.mubr.msk.f32.mxu0 %vm696_vm2, %v6871_v26  ;;  %v4432_v26 = vld [vmem:[#allocation13 + $0x60] sm:$0xff] }
 0x78f   : > { %v6026_v28 = vpack.c.bf16 %v4433_v24, %v4432_v26 }
 0x790   : > { %6009 = vmatpush3.bf16.msra.mxu0 %v6006_v9  ;;  %5993 = vmatpush3.bf16.msra.mxu1 %v5990_v10  ;;  %v4927_v10 = vld [vmem:[%s7006_s13] ss:$0 sm:$0xff] }
 0x791   : > { %6019 = vmatprep.subr.bf16.mxu0 %v6018_v16  ;;  %6011 = vmatprep.subr.bf16.mxu1 %v6010_v17 }
 0x793   : > { %5622 = vmatmul.mubr.msk.f32.vlgmr.msra.gmra.mrb[8].mxu1 %vm696_vm2, %v3898_v8  ;;  %5644 = vmatmul.mubr.msk.f32.vlgmr.msra.gmra.mrb[14].mxu0 %vm696_vm2, %v3898_v8 }
 0x794   : > { %6021 = vmatpush3.bf16.msra.mxu0 %v6018_v16  ;;  %6013 = vmatpush3.bf16.msra.mxu1 %v6010_v17 }
 0x795   : > { %5654 = vmatprep.mubr.msk.f32.mxu1 %vm696_vm2, %v3909_v12  ;;  %5665 = vmatprep.mubr.msk.f32.mxu0 %vm696_vm2, %v3909_v12 }
 0x796   : > { %6023 = vmatprep.subr.bf16.mxu0 %v6022_v20  ;;  %6015 = vmatprep.subr.bf16.mxu1 %v6014_v21 }
 0x798   : > { %6025 = vmatpush3.bf16.msra.mxu0 %v6022_v20  ;;  %6017 = vmatpush3.bf16.msra.mxu1 %v6014_v21 }
 0x799   : > { %6027 = vmatprep.subr.bf16.mxu1 %v6026_v28  ;;  %6035 = vmatprep.subr.bf16.mxu0 %v6034_v55 }
 0x79b   : > { %5655 = vmatmul.mubr.msk.f32.vlgmr.msra.gmra.mrb[8].mxu1 %vm696_vm2, %v6891_v0  ;;  %5666 = vmatmul.mubr.msk.f32.vlgmr.msra.gmra.mrb[14].mxu0 %vm696_vm2, %v6891_v0  ;;  %v4920_v0 = vld [vmem:[#allocation10 + $0x3] ss:$0 sm:$0xff] }
 0x79c   : > { %6029 = vmatpush3.bf16.msra.mxu1 %v6026_v28  ;;  %6037 = vmatpush3.bf16.msra.mxu0 %v6034_v55 }
 0x79d   : > { %6031 = vmatprep.subr.bf16.mxu1 %v6030_v33  ;;  %6039 = vmatprep.subr.bf16.mxu0 %v6038_v58 }
 0x7a0   : > { %6033 = vmatpush3.bf16.msra.mxu1 %v6030_v33  ;;  %6041 = vmatpush3.bf16.msra.mxu0 %v6038_v58 }
 0x86e   : > { %v5656_v34 = vpop.f32.mrb[8].mxu1  ;;  %v5667_v32 = vpop.f32.mrb[14].mxu0 }
 0x86f   : > { %v4416_v35 = vadd.f32 %v5667_v32, %v4921_v31  ;;  %v4308_v36 = vpop.f32.mrb[9].mxu1  ;;  %v4390_v37 = vpop.f32.mrb[15].mxu0  ;;  %v4407_v41 = vadd.f32 %v5656_v34, %v4920_v0 }
 0x870   : > { %v4415_v38 = vadd.f32 %v4921_v31, %v4390_v37  ;;  %v4406_v42 = vadd.f32 %v4920_v0, %v4308_v36  ;;  %v4930_v36 = vld [vmem:[%s7034_s25] ss:$0 sm:$0xff] }
 0x871   : > { %v4923_v39 = vmul.f32 -1.442695, %v4416_v35 }
 0x872   : > { %v4922_v40 = vmul.f32 -1.442695, %v4415_v38  ;;  %v4931_v38 = vld [vmem:[%s7035_s20] ss:$0 sm:$0xff] }
 0x873   : > { %6221 = vpow2.f32 %v4923_v39 }
 0x874   : > { %6223 = vpow2.f32 %v4922_v40 }
 0x875   : > { %6225 = vtanh.f32 %v4407_v41 }
 0x876   : > { %6227 = vtanh.f32 %v4406_v42 }
 0x87d   : > { %v6222_v43 = vpop.eup %6221 }
 0x87e   : > { %v6224_v44 = vpop.eup %6223  ;;  %v4424_v45 = vadd.f32 1.0, %v6222_v43 }
 0x87f   : > { %v4423_v46 = vadd.f32 1.0, %v6224_v44  ;;  %v6226_v47 = vpop.eup %6225 }
 0x880   : > { %6229 = vrcp.f32 %v4424_v45  ;;  %v6228_v48 = vpop.eup %6227 }
 0x881   : > { %6231 = vrcp.f32 %v4423_v46 }
 0x88a   : > { %v6230_v49 = vpop.eup %6229 }
 0x88b   : > { %v6232_v50 = vpop.eup %6231  ;;  %v4430_v51 = vmul.f32 %v6230_v49, %v6226_v47 }
 0x88c   : > { %v4429_v52 = vmul.f32 %v6232_v50, %v6228_v48 }
 0x88e   : > { %5676 = vmatprep.mubr.msk.f32.mxu1 %vm696_vm2, %v4429_v52 }
 0x88f   : > { %5677 = vmatmul.mubr.msk.f32.vlgmr.msra.gmra.mrb[2].mxu1 %vm696_vm2, %v4430_v51 }
 0x962   : > { %v5678_v1 = vpop.f32.mrb[2].mxu1 }
 0x963   : > { %v6044_v3 = vadd.f32 %v6047_v63, %v5678_v1  ;;  %v4513_v4 = vpop.f32.mrb[3].mxu1 }
 0x964   : > { %v6048_v5 = vadd.f32 %v6047_v63, %v4513_v4 }
 0x965   : > { %v6045_v6 = vadd.f32 %v6044_v3, %v4924_v2 }
 0x966   : > { %v6049_v7 = vadd.f32 %v6048_v5, %v4924_v2 }
 0x967   : > { %v4525_v9 = vmul.f32 %v6045_v6, %v6747_v27 }
 0x968   : > { %v4524_v8 = vmul.f32 %v6049_v7, %v6749_v30 }
 0x96a   : > { %5687 = vmatprep.mubr.msk.f32.mxu0 %vm696_vm2, %v4524_v8 }
 0x96b   : > { %5688 = vmatmul.mubr.msk.f32.vlgmr.msra.gmra.mrb[16].mxu0 %vm696_vm2, %v4525_v9 }
 0xa3e   : > { %v5689_v11 = vpop.f32.mrb[16].mxu0 }
 0xa3f   : > { %v4609_v14 = vpop.f32.mrb[17].mxu0  ;;  %v4615_v12 = vadd.f32 %v5689_v11, %v4927_v10 }
 0xa40   : > { %v4610_v13 = vadd.f32 %v4927_v10, %v4609_v14 }
 0xa41   : > { %v4619_v17 = vmul.f32 %v6747_v27, %v4615_v12 }
 0xa42   : > { %v4618_v15 = vmul.f32 %v6749_v30, %v4610_v13 }
 0xa43   : > { %v4623_v18 = vsel %vm608_vm1, %v4619_v17, 0.0 }
 0xa44   : > { %v4620_v16 = vsel %vm608_vm1, %v4618_v15, 0.0 }
 0xa45   : > { %4621 = vadd.xlane.f32.xlu0 %v4620_v16 }
 0xa49   : > { %4624 = vadd.xlane.f32.xlu0 %v4623_v18 }
 0xad2   : > { %v4622_v22 = vpop.xlane.xlu0 %4621 }
 0xad3   : > { %v4627_v23 = vmul.f32 0.25, %v4622_v22 }
 0xad5   : > { %v4629_v19 = vsub.f32 %v4618_v15, %v4627_v23 }
 0xad6   : > { %v4625_v20 = vpop.xlane.xlu0 %4624 }
 0xad7   : > { %v4628_v21 = vmul.f32 0.25, %v4625_v20  ;;  %v4631_v26 = vmul.f32 %v4629_v19, %v4629_v19 }
 0xad9   : > { %v4630_v24 = vsub.f32 %v4619_v17, %v4628_v21  ;;  %v4633_v25 = vsel %vm608_vm1, %v4631_v26, 0.0 }
 0xada   : > { %4634 = vadd.xlane.f32.xlu1 %v4633_v25 }
 0xadb   : > { %v4632_v28 = vmul.f32 %v4630_v24, %v4630_v24 }
 0xadd   : > { %v4636_v30 = vsel %vm608_vm1, %v4632_v28, 0.0 }
 0xade   : > { %4637 = vadd.xlane.f32.xlu1 %v4636_v30 }
 0xb67   : > { %v4635_v27 = vpop.xlane.xlu1 %4634 }
 0xb68   : > { %v4639_v29 = vmul.f32 0.25, %v4635_v27 }
 0xb6a   : > { %v4641_v33 = vadd.f32 1e-05, %v4639_v29 }
 0xb6b   : > { %v4638_v31 = vpop.xlane.xlu1 %4637 }
 0xb6c   : > { %6233 = vrsqrt.f32 %v4641_v33  ;;  %v4640_v34 = vmul.f32 0.25, %v4638_v31 }
 0xb6e   : > { %v4642_v32 = vadd.f32 1e-05, %v4640_v34 }
 0xb70   : > { %6235 = vrsqrt.f32 %v4642_v32 }
 0xb76   : > { %v6234_v35 = vpop.eup %6233 }
 0xb77   : > { %v4645_v37 = vmul.f32 %v6234_v35, %v4629_v19 }
 0xb79   : > { %v4654_v39 = vmul.f32 %v4930_v36, %v4645_v37 }
 0xb7a   : > { %v6236_v40 = vpop.eup %6235 }
 0xb7b   : > { %v4663_v0 = vadd.f32 %v4931_v38, %v4654_v39  ;;  %v4646_v41 = vmul.f32 %v6236_v40, %v4630_v24 }
 0xb7d   : > { %4665 = vst.msk [vmem:[%s585_s15] sm:$0xff] %vm608_vm1, %v4663_v0  ;;  %v4655_v42 = vmul.f32 %v4930_v36, %v4646_v41 }
 0xb7f   : > { %v4664_v43 = vadd.f32 %v4931_v38, %v4655_v42 }
 0xb81   : > { %4666 = vst.msk [vmem:[%s585_s15 + $0x8] sm:$0xff] %vm608_vm1, %v4664_v43 }
 0xb82 PF: > { %s7037_s30 = sld [smem:[#allocation20_spill]] }
 0xb88   : > { %s36_s26 = sadd.s32 1, %s7037_s30  }
 0xb89   : > { %p33_p0 = scmp.ge.s32.totalorder %s36_s26, 4  }
 0xb8b   :  { %35 = sbr.rel (!%p33_p0) target bundleno = 26 (0x1a), region = 174 }
 0xb92   :  { %4689 = vsyncpa [#allocation6], 1 }
 0xb93   :  { %4691 = vsyncpa [#allocation6 + $0x1], 1 }
 0xb94   :  { %4692 = vsyncpa [#allocation8], 1 }
 0xb95   :  { %4693 = vsyncpa [#allocation11], 1 }
 0xb96   :  { %4694 = vsyncpa [#allocation14], 1 }

</bundles_post_ra>
